<compile_context>
chip_gen: v7x
topology: tpu7x:2x2x1
jax: 0.10.0
libtpu: 0.0.40
codegen_flags: <defaults>
</compile_context>

<pallas_src>
import jax
import jax.numpy as jnp
from jax.experimental import pallas as pl
from jax.experimental.pallas import tpu as pltpu

# ----------------------- small synthetic ESM2 config ------------------------
B, S = 2, 8            # batch, sequence length
BS = B * S             # flattened rows carried in VMEM
D = 128                # embed_dim (real ESM2-t33: 1280); 128 keeps lanes dense
H = 4                  # attention heads (real: 20)
DH = D // H            # head dim = 32
HALF = DH // 2         # rotary half = 16
FFN = 4 * D            # ffn_embed_dim (real: 5120)
NL = 3                 # encoder layers (real: 33)
VOCAB = 33             # ESM-1b alphabet size
EPS = 1e-5             # torch.nn.LayerNorm eps
CLS_IDX, PAD_IDX, EOS_IDX, MASK_IDX = 0, 1, 2, 32


# ------------------------------ shared math ----------------------------------
def _layer_norm(x, g, b):
    mu = jnp.mean(x, axis=-1, keepdims=True)
    var = jnp.mean((x - mu) ** 2, axis=-1, keepdims=True)
    return (x - mu) * jax.lax.rsqrt(var + EPS) * g + b


def _erf(x):
    # Abramowitz & Stegun 7.1.26 polynomial erf, |err| < 1.5e-7 (lowers cleanly
    # through Mosaic; the exp lands on the otherwise-idle EUP slot).
    a1, a2, a3, a4, a5 = 0.254829592, -0.284496736, 1.421413741, -1.453152027, 1.061405429
    p = 0.3275911
    sgn = jnp.where(x >= 0.0, 1.0, -1.0)
    ax = jnp.abs(x)
    t = 1.0 / (1.0 + p * ax)
    poly = ((((a5 * t + a4) * t + a3) * t + a2) * t + a1) * t
    return sgn * (1.0 - poly * jnp.exp(-ax * ax))


def _gelu_exact(x):
    # ESM's gelu: x * 0.5 * (1 + erf(x / sqrt(2)))
    return 0.5 * x * (1.0 + _erf(x * (2.0 ** -0.5)))


def _embed_esm2(tokens, embed):
    """Token embedding + ESM2 token-dropout rescale (plain-XLA glue)."""
    x = embed[tokens].astype(jnp.float32)                              # (B,S,D)
    mask_hits = tokens == MASK_IDX
    x = jnp.where(mask_hits[..., None], 0.0, x)
    padding_mask = tokens == PAD_IDX
    src_lengths = jnp.sum(~padding_mask, axis=-1).astype(jnp.float32)
    mask_ratio_observed = jnp.sum(mask_hits, axis=-1).astype(jnp.float32) / src_lengths
    x = x * (1.0 - 0.15 * 0.8) / (1.0 - mask_ratio_observed)[:, None, None]
    x = x * (1.0 - padding_mask[..., None].astype(x.dtype))
    return x


def make_rope_tables():
    """ESM RotaryEmbedding tables, plus batch-tiled full-width (B*S, D) tables
    that fold rotate_half's sign and half-selection in, so the kernel applies
    RoPE to the whole (B*S, D) q/k with two lane rotations and three FMAs."""
    inv_freq = 1.0 / (10000.0 ** (jnp.arange(0, DH, 2, dtype=jnp.float32) / DH))
    t = jnp.arange(S, dtype=jnp.float32)
    freqs = jnp.einsum("i,j->ij", t, inv_freq)                     # (S, DH/2)
    emb = jnp.concatenate([freqs, freqs], axis=-1)                 # (S, DH)
    cos, sin = jnp.cos(emb), jnp.sin(emb)

    cos_full = jnp.tile(cos, (1, H))                               # (S, D)
    sin_full = jnp.tile(sin, (1, H))
    first = jnp.tile(jnp.concatenate([jnp.ones((HALF,), jnp.float32),
                                      jnp.zeros((HALF,), jnp.float32)]), (H,))
    # rotated = x*cos_full + roll(x, -HALF)*sin_hi + roll(x, +HALF)*sin_lo
    sin_hi = -sin_full * first[None, :]          # first half of each head: -x2*sin
    sin_lo = sin_full * (1.0 - first)[None, :]   # second half of each head: +x1*sin
    # batch-tile so the kernel applies RoPE to the flattened (B*S, D) slab
    cos_bsd = jnp.tile(cos_full, (B, 1))
    sin_hi_bsd = jnp.tile(sin_hi, (B, 1))
    sin_lo_bsd = jnp.tile(sin_lo, (B, 1))
    return cos, sin, cos_bsd, sin_hi_bsd, sin_lo_bsd


# ------------------------------ fused Pallas kernel ---------------------------
def esm2_stack_kernel(x_ref, cos_ref, sinhi_ref, sinlo_ref,
                      wqkv_ref, bqkv_ref, wo_ref, bo_ref,
                      ln1g_ref, ln1b_ref, ln2g_ref, ln2b_ref,
                      w1_ref, b1_ref, w2_ref, b2_ref,
                      lnfg_ref, lnfb_ref,
                      o_ref, h_ref):
    """Grid = (NL,).  Each step runs one transformer layer on the VMEM-resident
    (B*S, D) activation; the last layer also applies the final LayerNorm and
    writes the full normalized hidden state (CLS rows sliced in the wrapper)."""
    l = pl.program_id(0)

    @pl.when(l == 0)
    def _():
        h_ref[...] = x_ref[...]                                    # (BS, D)

    x = h_ref[...]

    # ---- self-attention sub-block (pre-LN, rotary, scaled dot-product) ----
    xn = _layer_norm(x, ln1g_ref[0], ln1b_ref[0])
    xb = xn.astype(jnp.bfloat16)                                   # bf16 MXU operands
    # fused QKV projection: one (BS, D) @ (D, 3D) matmul
    qkv = jnp.dot(xb, wqkv_ref[0], preferred_element_type=jnp.float32) + bqkv_ref[0]
    q = qkv[:, 0:D] * (DH ** -0.5)                                 # ESM scales q only
    k = qkv[:, D:2 * D]
    v = qkv[:, 2 * D:3 * D]

    cos = cos_ref[...]
    sin_hi = sinhi_ref[...]
    sin_lo = sinlo_ref[...]

    def rope(t):
        # Full-width RoPE: two XLU lane rotations replace the per-head
        # rotate_half concatenates; sign/half-selection lives in the tables.
        from_hi = pltpu.roll(t, shift=D - HALF, axis=1)   # lane d <- lane d+HALF
        from_lo = pltpu.roll(t, shift=HALF, axis=1)       # lane d <- lane d-HALF
        return t * cos + from_hi * sin_hi + from_lo * sin_lo

    q = rope(q)
    k = rope(k)

    # per-batch attention; key transpose hoisted out of the head loop, and all
    # head contexts assembled into a full-width slab so the output projection
    # is a single K=128 MXU matmul.
    # TODO(synk): at H=20 use lax.fori_loop(..., unroll=True) instead of the
    #             static Python head loop to bound vreg live ranges.
    ctx_rows = []
    for b in range(B):                                             # static unroll, B=2
        rows = slice(b * S, (b + 1) * S)
        qb, kb, vb = q[rows, :], k[rows, :], v[rows, :]
        kbT = kb.T                                                 # one transpose per batch
        heads = []
        for h in range(H):                                         # static unroll, H=4
            sl = slice(h * DH, (h + 1) * DH)
            s = jnp.dot(qb[:, sl], kbT[sl, :], preferred_element_type=jnp.float32)
            m = jnp.max(s, axis=-1, keepdims=True)
            e = jnp.exp(s - m)
            p = e * pl.reciprocal(jnp.sum(e, axis=-1, keepdims=True), approx=True)
            heads.append(jnp.dot(p, vb[:, sl], preferred_element_type=jnp.float32))
        ctx_rows.append(jnp.concatenate(heads, axis=-1))           # (S, D)
    ctx = jnp.concatenate(ctx_rows, axis=0)                        # (BS, D)
    attn = jnp.dot(ctx.astype(jnp.bfloat16), wo_ref[0],
                   preferred_element_type=jnp.float32) + bo_ref[0]
    x = x + attn

    # ---- feed-forward sub-block (pre-LN, erf-GELU) ----
    xn2 = _layer_norm(x, ln2g_ref[0], ln2b_ref[0])
    hid = jnp.dot(xn2.astype(jnp.bfloat16), w1_ref[0],
                  preferred_element_type=jnp.float32) + b1_ref[0]
    hid = _gelu_exact(hid)
    ffn = jnp.dot(hid.astype(jnp.bfloat16), w2_ref[0],
                  preferred_element_type=jnp.float32) + b2_ref[0]
    x = x + ffn

    h_ref[...] = x                                                 # carry to next layer

    @pl.when(l == pl.num_programs(0) - 1)
    def _():
        # emb_layer_norm_after on all rows; wrapper slices the CLS/BOS rows.
        o_ref[...] = _layer_norm(x, lnfg_ref[...], lnfb_ref[...])


# ------------------------------ wrappers --------------------------------------
def esm2_forward(tokens, embed, cos_bsd, sin_hi_bsd, sin_lo_bsd, params, lnf_g, lnf_b):
    """Returns representations[NL][:, 0, :] — shape (B, D)."""
    x = _embed_esm2(tokens, embed).reshape(BS, D)                  # (B*S, D)

    def layer_block(arr):  # stacked (NL, r, c) param -> (1, r, c) block of layer l
        return pl.BlockSpec((1,) + tuple(arr.shape[1:]), lambda l: (l, 0, 0))

    def const_block(arr):  # constant-index block: fetched once per call
        return pl.BlockSpec(tuple(arr.shape), lambda l: (0,) * arr.ndim)

    in_specs = ([const_block(x), const_block(cos_bsd),
                 const_block(sin_hi_bsd), const_block(sin_lo_bsd)]
                + [layer_block(p) for p in params]
                + [const_block(lnf_g), const_block(lnf_b)])

    flops = NL * (2 * BS * D * 3 * D          # fused QKV projection
                  + 4 * B * H * S * S * DH    # scores + context
                  + 2 * BS * D * D            # output projection
                  + 4 * BS * D * FFN)         # two FFN matmuls
    transcendentals = NL * (B * H * S * S + B * H * S + BS * FFN)
    param_bytes = sum(int(p.size) * p.dtype.itemsize for p in params)
    bytes_accessed = (param_bytes + 4 * BS * D * 4              # x + rope tables
                      + BS * D * 4 + 2 * D * 4)                 # output + final LN

    out = pl.pallas_call(
        esm2_stack_kernel,
        out_shape=jax.ShapeDtypeStruct((BS, D), jnp.float32),
        grid=(NL,),
        in_specs=in_specs,
        out_specs=pl.BlockSpec((BS, D), lambda l: (0, 0)),
        scratch_shapes=[pltpu.VMEM((BS, D), jnp.float32)],         # resident activation
        compiler_params=pltpu.CompilerParams(
            dimension_semantics=("arbitrary",)),
        cost_estimate=pl.CostEstimate(flops=flops,
                                      transcendentals=transcendentals,
                                      bytes_accessed=bytes_accessed),
    )(x, cos_bsd, sin_hi_bsd, sin_lo_bsd, *params, lnf_g, lnf_b)
    return out.reshape(B, S, D)[:, 0, :]                           # (B, D)


# ------------------------------ param init ------------------------------------
def init_stacked_params(key):
    def nrm(i, shape, scale):
        return jax.random.normal(jax.random.fold_in(key, i), shape, jnp.float32) * scale

    wqkv = nrm(0, (NL, D, 3 * D), 0.05).astype(jnp.bfloat16)  # (in, out) layout, bf16 at rest
    bqkv = nrm(1, (NL, 1, 3 * D), 0.02)
    wo = nrm(2, (NL, D, D), 0.05).astype(jnp.bfloat16)
    bo = nrm(3, (NL, 1, D), 0.02)
    ln1g = 1.0 + nrm(4, (NL, 1, D), 0.05)
    ln1b = nrm(5, (NL, 1, D), 0.02)
    ln2g = 1.0 + nrm(6, (NL, 1, D), 0.05)
    ln2b = nrm(7, (NL, 1, D), 0.02)
    w1 = nrm(8, (NL, D, FFN), 0.05).astype(jnp.bfloat16)
    b1 = nrm(9, (NL, 1, FFN), 0.02)
    w2 = nrm(10, (NL, FFN, D), 0.05).astype(jnp.bfloat16)
    b2 = nrm(11, (NL, 1, D), 0.02)
    # order must match esm2_stack_kernel's signature
    return [wqkv, bqkv, wo, bo, ln1g, ln1b, ln2g, ln2b, w1, b1, w2, b2]


# ------------------------------ pure-JAX reference ----------------------------
def esm2_reference(tokens, embed, cos, sin, params, lnf_g, lnf_b):
    """Reference forward with the same (bf16-rounded) numerics for validation."""
    (wqkv, bqkv, wo, bo, ln1g, ln1b, ln2g, ln2b, w1, b1, w2, b2) = params
    hp = jax.lax.Precision.HIGHEST

    def mm(a, w):  # mirror the kernel: bf16 operands, f32 accumulation
        return jnp.dot(a.astype(jnp.bfloat16).astype(jnp.float32),
                       w.astype(jnp.float32), precision=hp)

    def rope3(t):  # t: (S, H, DH) — standard ESM rotate_half formulation
        t1, t2 = t[..., :HALF], t[..., HALF:]
        rot = jnp.concatenate([-t2, t1], axis=-1)
        return t * cos[:, None, :] + rot * sin[:, None, :]

    x_all = _embed_esm2(tokens, embed)                             # (B, S, D)
    outs = []
    for bi in range(B):
        x = x_all[bi]
        for l in range(NL):
            xn = _layer_norm(x, ln1g[l], ln1b[l])
            qkv = mm(xn, wqkv[l]) + bqkv[l]
            q = qkv[:, :D] * (DH ** -0.5)
            k = qkv[:, D:2 * D]
            v = qkv[:, 2 * D:]
            q3 = rope3(q.reshape(S, H, DH))
            k3 = rope3(k.reshape(S, H, DH))
            v3 = v.reshape(S, H, DH)
            sc = jnp.einsum("shd,thd->hst", q3, k3, precision=hp)
            pr = jax.nn.softmax(sc, axis=-1)
            ctx = jnp.einsum("hst,thd->shd", pr, v3, precision=hp).reshape(S, D)
            x = x + mm(ctx, wo[l]) + bo[l]
            xn2 = _layer_norm(x, ln2g[l], ln2b[l])
            hid = _gelu_exact(mm(xn2, w1[l]) + b1[l])
            x = x + mm(hid, w2[l]) + b2[l]
        outs.append(_layer_norm(x, lnf_g, lnf_b)[0])
    return jnp.stack(outs, axis=0)                                 # (B, D)


if __name__ == "__main__":
    key = jax.random.PRNGKey(0)
    k_tok, k_emb, k_par = jax.random.split(key, 3)

    # input_ids: (B, S) int32 tokens; BOS at position 0, EOS at the end,
    # standard amino-acid tokens (ids 4..23) elsewhere (no PAD / MASK).
    tokens = jax.random.randint(k_tok, (B, S), 4, 24, dtype=jnp.int32)
    tokens = tokens.at[:, 0].set(CLS_IDX).at[:, -1].set(EOS_IDX)

    # embed_tokens (padding row zeroed, like nn.Embedding(padding_idx=1))
    embed = jax.random.normal(k_emb, (VOCAB, D), jnp.float32) * 0.05
    embed = embed.at[PAD_IDX].set(0.0)

    cos, sin, cos_bsd, sin_hi_bsd, sin_lo_bsd = make_rope_tables()
    params = init_stacked_params(k_par)
    lnf_g = 1.0 + jax.random.normal(jax.random.fold_in(k_par, 100), (1, D), jnp.float32) * 0.05
    lnf_b = jax.random.normal(jax.random.fold_in(k_par, 101), (1, D), jnp.float32) * 0.02

    fwd = jax.jit(esm2_forward)
    out = jax.block_until_ready(fwd(tokens, embed, cos_bsd, sin_hi_bsd, sin_lo_bsd,
                                    params, lnf_g, lnf_b))
    assert out.shape == (B, D) and out.dtype == jnp.float32
    assert bool(jnp.all(jnp.isfinite(out)))

    # correctness check against the pure-JAX reference (bf16-level tolerance)
    ref = jax.block_until_ready(
        esm2_reference(tokens, embed, cos, sin, params, lnf_g, lnf_b))
    max_err = float(jnp.max(jnp.abs(out - ref)))
    assert bool(jnp.allclose(out, ref, rtol=2e-2, atol=2e-2)), max_err

    print("KERNEL_OK")
</pallas_src>

<mosaic_0001>
module attributes {stable_mosaic.version = 11 : i64} {
  func.func @esm2_stack_kernel(%arg0: i32, %arg1: memref<16x128xf32, #tpu.memory_space<vmem>>, %arg2: memref<16x128xf32, #tpu.memory_space<vmem>>, %arg3: memref<16x128xf32, #tpu.memory_space<vmem>>, %arg4: memref<16x128xf32, #tpu.memory_space<vmem>>, %arg5: memref<1x128x384xbf16, #tpu.memory_space<vmem>>, %arg6: memref<1x1x384xf32, #tpu.memory_space<vmem>>, %arg7: memref<1x128x128xbf16, #tpu.memory_space<vmem>>, %arg8: memref<1x1x128xf32, #tpu.memory_space<vmem>>, %arg9: memref<1x1x128xf32, #tpu.memory_space<vmem>>, %arg10: memref<1x1x128xf32, #tpu.memory_space<vmem>>, %arg11: memref<1x1x128xf32, #tpu.memory_space<vmem>>, %arg12: memref<1x1x128xf32, #tpu.memory_space<vmem>>, %arg13: memref<1x128x512xbf16, #tpu.memory_space<vmem>>, %arg14: memref<1x1x512xf32, #tpu.memory_space<vmem>>, %arg15: memref<1x512x128xbf16, #tpu.memory_space<vmem>>, %arg16: memref<1x1x128xf32, #tpu.memory_space<vmem>>, %arg17: memref<1x128xf32, #tpu.memory_space<vmem>>, %arg18: memref<1x128xf32, #tpu.memory_space<vmem>>, %arg19: memref<16x128xf32, #tpu.memory_space<vmem>>, %arg20: memref<16x128xf32, #tpu.memory_space<vmem>>) attributes {dimension_semantics = [#tpu.dimension_semantics<arbitrary>], iteration_bounds = array<i64: 3>, scalar_prefetch = 0 : i64, scratch_operands = 1 : i64, tpu.core_type = #tpu.core_type<tc>, window_params = [{pipeline_mode = #tpu.pipeline_mode<synchronous>, transform_indices = @transform_0, window_bounds = array<i64: 16, 128>}, {pipeline_mode = #tpu.pipeline_mode<synchronous>, transform_indices = @transform_1, window_bounds = array<i64: 16, 128>}, {pipeline_mode = #tpu.pipeline_mode<synchronous>, transform_indices = @transform_2, window_bounds = array<i64: 16, 128>}, {pipeline_mode = #tpu.pipeline_mode<synchronous>, transform_indices = @transform_3, window_bounds = array<i64: 16, 128>}, {transform_indices = @transform_4, window_bounds = array<i64: 1, 128, 384>}, {transform_indices = @transform_5, window_bounds = array<i64: 1, 1, 384>}, {transform_indices = @transform_6, window_bounds = array<i64: 1, 128, 128>}, {transform_indices = @transform_7, window_bounds = array<i64: 1, 1, 128>}, {transform_indices = @transform_8, window_bounds = array<i64: 1, 1, 128>}, {transform_indices = @transform_9, window_bounds = array<i64: 1, 1, 128>}, {transform_indices = @transform_10, window_bounds = array<i64: 1, 1, 128>}, {transform_indices = @transform_11, window_bounds = array<i64: 1, 1, 128>}, {transform_indices = @transform_12, window_bounds = array<i64: 1, 128, 512>}, {transform_indices = @transform_13, window_bounds = array<i64: 1, 1, 512>}, {transform_indices = @transform_14, window_bounds = array<i64: 1, 512, 128>}, {transform_indices = @transform_15, window_bounds = array<i64: 1, 1, 128>}, {pipeline_mode = #tpu.pipeline_mode<synchronous>, transform_indices = @transform_16, window_bounds = array<i64: 1, 128>}, {pipeline_mode = #tpu.pipeline_mode<synchronous>, transform_indices = @transform_17, window_bounds = array<i64: 1, 128>}, {pipeline_mode = #tpu.pipeline_mode<synchronous>, transform_indices = @transform_18, window_bounds = array<i64: 16, 128>}]} {
    %c0_i32 = arith.constant 0 : i32
    %0 = arith.cmpi eq, %arg0, %c0_i32 : i32
    %1 = arith.extui %0 : i1 to i32
    %c0_i32_0 = arith.constant 0 : i32
    %2 = arith.cmpi ne, %1, %c0_i32_0 : i32
    scf.if %2 {
      %c0_111 = arith.constant 0 : index
      %c0_112 = arith.constant 0 : index
      %288 = vector.load %arg1[%c0_111, %c0_112] : memref<16x128xf32, #tpu.memory_space<vmem>>, vector<16x128xf32>
      %c0_113 = arith.constant 0 : index
      %c0_114 = arith.constant 0 : index
      %289 = vector.load %arg20[%c0_113, %c0_114] : memref<16x128xf32, #tpu.memory_space<vmem>>, vector<16x128xf32>
      tpu.vector_store %arg20[%c0_113, %c0_114], %288 {strides = array<i32>} : memref<16x128xf32, #tpu.memory_space<vmem>>, vector<16x128xf32>,
    } else {
    }
    %c0 = arith.constant 0 : index
    %c0_1 = arith.constant 0 : index
    %3 = vector.load %arg20[%c0, %c0_1] : memref<16x128xf32, #tpu.memory_space<vmem>>, vector<16x128xf32>
    %c0_2 = arith.constant 0 : index
    %c0_3 = arith.constant 0 : index
    %c0_4 = arith.constant 0 : index
    %4 = vector.load %arg9[%c0_2, %c0_3, %c0_4] : memref<1x1x128xf32, #tpu.memory_space<vmem>>, vector<1x1x128xf32>
    %5 = vector.shape_cast %4 : vector<1x1x128xf32> to vector<1x128xf32>
    %c0_5 = arith.constant 0 : index
    %c0_6 = arith.constant 0 : index
    %c0_7 = arith.constant 0 : index
    %6 = vector.load %arg10[%c0_5, %c0_6, %c0_7] : memref<1x1x128xf32, #tpu.memory_space<vmem>>, vector<1x1x128xf32>
    %7 = vector.shape_cast %6 : vector<1x1x128xf32> to vector<1x128xf32>
    %cst = arith.constant dense<0.000000e+00> : vector<16xf32>
    %8 = vector.multi_reduction <add>, %3, %cst [1] : vector<16x128xf32> to vector<16xf32>
    %9 = vector.shape_cast %8 : vector<16xf32> to vector<16x1xf32>
    %cst_8 = arith.constant 1.280000e+02 : f32
    %10 = vector.broadcast %cst_8 : f32 to vector<16x1xf32>
    %11 = arith.divf %9, %10 : vector<16x1xf32>
    %12 = vector.broadcast %11 : vector<16x1xf32> to vector<16x128xf32>
    %13 = arith.subf %3, %12 : vector<16x128xf32>
    %14 = arith.mulf %13, %13 : vector<16x128xf32>
    %cst_9 = arith.constant dense<0.000000e+00> : vector<16xf32>
    %15 = vector.multi_reduction <add>, %14, %cst_9 [1] : vector<16x128xf32> to vector<16xf32>
    %16 = vector.shape_cast %15 : vector<16xf32> to vector<16x1xf32>
    %cst_10 = arith.constant 1.280000e+02 : f32
    %17 = vector.broadcast %cst_10 : f32 to vector<16x1xf32>
    %18 = arith.divf %16, %17 : vector<16x1xf32>
    %19 = vector.broadcast %11 : vector<16x1xf32> to vector<16x128xf32>
    %20 = arith.subf %3, %19 : vector<16x128xf32>
    %cst_11 = arith.constant 9.99999974E-6 : f32
    %21 = vector.broadcast %cst_11 : f32 to vector<16x1xf32>
    %22 = arith.addf %18, %21 : vector<16x1xf32>
    %23 = math.rsqrt %22 : vector<16x1xf32>
    %24 = vector.broadcast %23 : vector<16x1xf32> to vector<16x128xf32>
    %25 = arith.mulf %20, %24 : vector<16x128xf32>
    %26 = vector.broadcast %5 : vector<1x128xf32> to vector<16x128xf32>
    %27 = arith.mulf %25, %26 : vector<16x128xf32>
    %28 = vector.broadcast %7 : vector<1x128xf32> to vector<16x128xf32>
    %29 = arith.addf %27, %28 : vector<16x128xf32>
    %30 = arith.truncf %29 : vector<16x128xf32> to vector<16x128xbf16>
    %c0_12 = arith.constant 0 : index
    %c0_13 = arith.constant 0 : index
    %c0_14 = arith.constant 0 : index
    %31 = vector.load %arg5[%c0_12, %c0_13, %c0_14] : memref<1x128x384xbf16, #tpu.memory_space<vmem>>, vector<1x128x384xbf16>
    %32 = vector.shape_cast %31 : vector<1x128x384xbf16> to vector<128x384xbf16>
    %cst_15 = arith.constant dense<0.000000e+00> : vector<16x384xf32>
    %33 = tpu.matmul %30, %32, %cst_15 {dimension_numbers = #tpu.dot_dimension_numbers<[1], [0], [0], [1], [0, 0, 1, 1], [], []>} : vector<16x128xbf16>, vector<128x384xbf16>, vector<16x384xf32> -> vector<16x384xf32>
    %c0_16 = arith.constant 0 : index
    %c0_17 = arith.constant 0 : index
    %c0_18 = arith.constant 0 : index
    %34 = vector.load %arg6[%c0_16, %c0_17, %c0_18] : memref<1x1x384xf32, #tpu.memory_space<vmem>>, vector<1x1x384xf32>
    %35 = vector.shape_cast %34 : vector<1x1x384xf32> to vector<1x384xf32>
    %36 = vector.broadcast %35 : vector<1x384xf32> to vector<16x384xf32>
    %37 = arith.addf %33, %36 : vector<16x384xf32>
    %38 = vector.extract_strided_slice %37 {offsets = [0, 0], sizes = [16, 128], strides = [1, 1]} : vector<16x384xf32> to vector<16x128xf32>
    %cst_19 = arith.constant 0.176776692 : f32
    %39 = vector.broadcast %cst_19 : f32 to vector<16x128xf32>
    %40 = arith.mulf %38, %39 : vector<16x128xf32>
    %41 = vector.extract_strided_slice %37 {offsets = [0, 128], sizes = [16, 128], strides = [1, 1]} : vector<16x384xf32> to vector<16x128xf32>
    %42 = vector.extract_strided_slice %37 {offsets = [0, 256], sizes = [16, 128], strides = [1, 1]} : vector<16x384xf32> to vector<16x128xf32>
    %c0_20 = arith.constant 0 : index
    %c0_21 = arith.constant 0 : index
    %43 = vector.load %arg2[%c0_20, %c0_21] : memref<16x128xf32, #tpu.memory_space<vmem>>, vector<16x128xf32>
    %c0_22 = arith.constant 0 : index
    %c0_23 = arith.constant 0 : index
    %44 = vector.load %arg3[%c0_22, %c0_23] : memref<16x128xf32, #tpu.memory_space<vmem>>, vector<16x128xf32>
    %c0_24 = arith.constant 0 : index
    %c0_25 = arith.constant 0 : index
    %45 = vector.load %arg4[%c0_24, %c0_25] : memref<16x128xf32, #tpu.memory_space<vmem>>, vector<16x128xf32>
    %c112_i32 = arith.constant 112 : i32
    %46 = tpu.dynamic_rotate %40 by %c112_i32 dim 1 : vector<16x128xf32>, i32 -> vector<16x128xf32>
    %c16_i32 = arith.constant 16 : i32
    %47 = tpu.dynamic_rotate %40 by %c16_i32 dim 1 : vector<16x128xf32>, i32 -> vector<16x128xf32>
    %48 = arith.mulf %40, %43 : vector<16x128xf32>
    %49 = arith.mulf %46, %44 : vector<16x128xf32>
    %50 = arith.addf %48, %49 : vector<16x128xf32>
    %51 = arith.mulf %47, %45 : vector<16x128xf32>
    %52 = arith.addf %50, %51 : vector<16x128xf32>
    %c112_i32_26 = arith.constant 112 : i32
    %53 = tpu.dynamic_rotate %41 by %c112_i32_26 dim 1 : vector<16x128xf32>, i32 -> vector<16x128xf32>
    %c16_i32_27 = arith.constant 16 : i32
    %54 = tpu.dynamic_rotate %41 by %c16_i32_27 dim 1 : vector<16x128xf32>, i32 -> vector<16x128xf32>
    %55 = arith.mulf %41, %43 : vector<16x128xf32>
    %56 = arith.mulf %53, %44 : vector<16x128xf32>
    %57 = arith.addf %55, %56 : vector<16x128xf32>
    %58 = arith.mulf %54, %45 : vector<16x128xf32>
    %59 = arith.addf %57, %58 : vector<16x128xf32>
    %60 = vector.extract_strided_slice %52 {offsets = [0, 0], sizes = [8, 128], strides = [1, 1]} : vector<16x128xf32> to vector<8x128xf32>
    %61 = vector.extract_strided_slice %59 {offsets = [0, 0], sizes = [8, 128], strides = [1, 1]} : vector<16x128xf32> to vector<8x128xf32>
    %62 = vector.extract_strided_slice %42 {offsets = [0, 0], sizes = [8, 128], strides = [1, 1]} : vector<16x128xf32> to vector<8x128xf32>
    %63 = tpu.transpose %61, [1, 0] : vector<8x128xf32> -> vector<128x8xf32>
    %64 = vector.extract_strided_slice %60 {offsets = [0, 0], sizes = [8, 32], strides = [1, 1]} : vector<8x128xf32> to vector<8x32xf32>
    %65 = vector.extract_strided_slice %63 {offsets = [0, 0], sizes = [32, 8], strides = [1, 1]} : vector<128x8xf32> to vector<32x8xf32>
    %cst_28 = arith.constant dense<0.000000e+00> : vector<8x8xf32>
    %66 = tpu.matmul %64, %65, %cst_28 {dimension_numbers = #tpu.dot_dimension_numbers<[1], [0], [0], [1], [0, 0, 1, 1], [], []>} : vector<8x32xf32>, vector<32x8xf32>, vector<8x8xf32> -> vector<8x8xf32>
    %cst_29 = arith.constant dense<0xFF800000> : vector<8xf32>
    %67 = vector.multi_reduction <maximumf>, %66, %cst_29 [1] : vector<8x8xf32> to vector<8xf32>
    %68 = vector.shape_cast %67 : vector<8xf32> to vector<8x1xf32>
    %69 = vector.broadcast %68 : vector<8x1xf32> to vector<8x8xf32>
    %70 = arith.subf %66, %69 : vector<8x8xf32>
    %71 = math.exp %70 : vector<8x8xf32>
    %cst_30 = arith.constant dense<0.000000e+00> : vector<8xf32>
    %72 = vector.multi_reduction <add>, %71, %cst_30 [1] : vector<8x8xf32> to vector<8xf32>
    %73 = vector.shape_cast %72 : vector<8xf32> to vector<8x1xf32>
    %74 = tpu.reciprocal %73 {approx = true} : vector<8x1xf32> -> vector<8x1xf32>
    %75 = vector.broadcast %74 : vector<8x1xf32> to vector<8x8xf32>
    %76 = arith.mulf %71, %75 : vector<8x8xf32>
    %77 = vector.extract_strided_slice %62 {offsets = [0, 0], sizes = [8, 32], strides = [1, 1]} : vector<8x128xf32> to vector<8x32xf32>
    %cst_31 = arith.constant dense<0.000000e+00> : vector<8x32xf32>
    %78 = tpu.matmul %76, %77, %cst_31 {dimension_numbers = #tpu.dot_dimension_numbers<[1], [0], [0], [1], [0, 0, 1, 1], [], []>} : vector<8x8xf32>, vector<8x32xf32>, vector<8x32xf32> -> vector<8x32xf32>
    %79 = vector.extract_strided_slice %60 {offsets = [0, 32], sizes = [8, 32], strides = [1, 1]} : vector<8x128xf32> to vector<8x32xf32>
    %80 = vector.extract_strided_slice %63 {offsets = [32, 0], sizes = [32, 8], strides = [1, 1]} : vector<128x8xf32> to vector<32x8xf32>
    %cst_32 = arith.constant dense<0.000000e+00> : vector<8x8xf32>
    %81 = tpu.matmul %79, %80, %cst_32 {dimension_numbers = #tpu.dot_dimension_numbers<[1], [0], [0], [1], [0, 0, 1, 1], [], []>} : vector<8x32xf32>, vector<32x8xf32>, vector<8x8xf32> -> vector<8x8xf32>
    %cst_33 = arith.constant dense<0xFF800000> : vector<8xf32>
    %82 = vector.multi_reduction <maximumf>, %81, %cst_33 [1] : vector<8x8xf32> to vector<8xf32>
    %83 = vector.shape_cast %82 : vector<8xf32> to vector<8x1xf32>
    %84 = vector.broadcast %83 : vector<8x1xf32> to vector<8x8xf32>
    %85 = arith.subf %81, %84 : vector<8x8xf32>
    %86 = math.exp %85 : vector<8x8xf32>
    %cst_34 = arith.constant dense<0.000000e+00> : vector<8xf32>
    %87 = vector.multi_reduction <add>, %86, %cst_34 [1] : vector<8x8xf32> to vector<8xf32>
    %88 = vector.shape_cast %87 : vector<8xf32> to vector<8x1xf32>
    %89 = tpu.reciprocal %88 {approx = true} : vector<8x1xf32> -> vector<8x1xf32>
    %90 = vector.broadcast %89 : vector<8x1xf32> to vector<8x8xf32>
    %91 = arith.mulf %86, %90 : vector<8x8xf32>
    %92 = vector.extract_strided_slice %62 {offsets = [0, 32], sizes = [8, 32], strides = [1, 1]} : vector<8x128xf32> to vector<8x32xf32>
    %cst_35 = arith.constant dense<0.000000e+00> : vector<8x32xf32>
    %93 = tpu.matmul %91, %92, %cst_35 {dimension_numbers = #tpu.dot_dimension_numbers<[1], [0], [0], [1], [0, 0, 1, 1], [], []>} : vector<8x8xf32>, vector<8x32xf32>, vector<8x32xf32> -> vector<8x32xf32>
    %94 = vector.extract_strided_slice %60 {offsets = [0, 64], sizes = [8, 32], strides = [1, 1]} : vector<8x128xf32> to vector<8x32xf32>
    %95 = vector.extract_strided_slice %63 {offsets = [64, 0], sizes = [32, 8], strides = [1, 1]} : vector<128x8xf32> to vector<32x8xf32>
    %cst_36 = arith.constant dense<0.000000e+00> : vector<8x8xf32>
    %96 = tpu.matmul %94, %95, %cst_36 {dimension_numbers = #tpu.dot_dimension_numbers<[1], [0], [0], [1], [0, 0, 1, 1], [], []>} : vector<8x32xf32>, vector<32x8xf32>, vector<8x8xf32> -> vector<8x8xf32>
    %cst_37 = arith.constant dense<0xFF800000> : vector<8xf32>
    %97 = vector.multi_reduction <maximumf>, %96, %cst_37 [1] : vector<8x8xf32> to vector<8xf32>
    %98 = vector.shape_cast %97 : vector<8xf32> to vector<8x1xf32>
    %99 = vector.broadcast %98 : vector<8x1xf32> to vector<8x8xf32>
    %100 = arith.subf %96, %99 : vector<8x8xf32>
    %101 = math.exp %100 : vector<8x8xf32>
    %cst_38 = arith.constant dense<0.000000e+00> : vector<8xf32>
    %102 = vector.multi_reduction <add>, %101, %cst_38 [1] : vector<8x8xf32> to vector<8xf32>
    %103 = vector.shape_cast %102 : vector<8xf32> to vector<8x1xf32>
    %104 = tpu.reciprocal %103 {approx = true} : vector<8x1xf32> -> vector<8x1xf32>
    %105 = vector.broadcast %104 : vector<8x1xf32> to vector<8x8xf32>
    %106 = arith.mulf %101, %105 : vector<8x8xf32>
    %107 = vector.extract_strided_slice %62 {offsets = [0, 64], sizes = [8, 32], strides = [1, 1]} : vector<8x128xf32> to vector<8x32xf32>
    %cst_39 = arith.constant dense<0.000000e+00> : vector<8x32xf32>
    %108 = tpu.matmul %106, %107, %cst_39 {dimension_numbers = #tpu.dot_dimension_numbers<[1], [0], [0], [1], [0, 0, 1, 1], [], []>} : vector<8x8xf32>, vector<8x32xf32>, vector<8x32xf32> -> vector<8x32xf32>
    %109 = vector.extract_strided_slice %60 {offsets = [0, 96], sizes = [8, 32], strides = [1, 1]} : vector<8x128xf32> to vector<8x32xf32>
    %110 = vector.extract_strided_slice %63 {offsets = [96, 0], sizes = [32, 8], strides = [1, 1]} : vector<128x8xf32> to vector<32x8xf32>
    %cst_40 = arith.constant dense<0.000000e+00> : vector<8x8xf32>
    %111 = tpu.matmul %109, %110, %cst_40 {dimension_numbers = #tpu.dot_dimension_numbers<[1], [0], [0], [1], [0, 0, 1, 1], [], []>} : vector<8x32xf32>, vector<32x8xf32>, vector<8x8xf32> -> vector<8x8xf32>
    %cst_41 = arith.constant dense<0xFF800000> : vector<8xf32>
    %112 = vector.multi_reduction <maximumf>, %111, %cst_41 [1] : vector<8x8xf32> to vector<8xf32>
    %113 = vector.shape_cast %112 : vector<8xf32> to vector<8x1xf32>
    %114 = vector.broadcast %113 : vector<8x1xf32> to vector<8x8xf32>
    %115 = arith.subf %111, %114 : vector<8x8xf32>
    %116 = math.exp %115 : vector<8x8xf32>
    %cst_42 = arith.constant dense<0.000000e+00> : vector<8xf32>
    %117 = vector.multi_reduction <add>, %116, %cst_42 [1] : vector<8x8xf32> to vector<8xf32>
    %118 = vector.shape_cast %117 : vector<8xf32> to vector<8x1xf32>
    %119 = tpu.reciprocal %118 {approx = true} : vector<8x1xf32> -> vector<8x1xf32>
    %120 = vector.broadcast %119 : vector<8x1xf32> to vector<8x8xf32>
    %121 = arith.mulf %116, %120 : vector<8x8xf32>
    %122 = vector.extract_strided_slice %62 {offsets = [0, 96], sizes = [8, 32], strides = [1, 1]} : vector<8x128xf32> to vector<8x32xf32>
    %cst_43 = arith.constant dense<0.000000e+00> : vector<8x32xf32>
    %123 = tpu.matmul %121, %122, %cst_43 {dimension_numbers = #tpu.dot_dimension_numbers<[1], [0], [0], [1], [0, 0, 1, 1], [], []>} : vector<8x8xf32>, vector<8x32xf32>, vector<8x32xf32> -> vector<8x32xf32>
    %124 = tpu.concatenate %78, %93, %108, %123 in 1 : vector<8x32xf32>, vector<8x32xf32>, vector<8x32xf32>, vector<8x32xf32> -> vector<8x128xf32>
    %125 = vector.extract_strided_slice %52 {offsets = [8, 0], sizes = [8, 128], strides = [1, 1]} : vector<16x128xf32> to vector<8x128xf32>
    %126 = vector.extract_strided_slice %59 {offsets = [8, 0], sizes = [8, 128], strides = [1, 1]} : vector<16x128xf32> to vector<8x128xf32>
    %127 = vector.extract_strided_slice %42 {offsets = [8, 0], sizes = [8, 128], strides = [1, 1]} : vector<16x128xf32> to vector<8x128xf32>
    %128 = tpu.transpose %126, [1, 0] : vector<8x128xf32> -> vector<128x8xf32>
    %129 = vector.extract_strided_slice %125 {offsets = [0, 0], sizes = [8, 32], strides = [1, 1]} : vector<8x128xf32> to vector<8x32xf32>
    %130 = vector.extract_strided_slice %128 {offsets = [0, 0], sizes = [32, 8], strides = [1, 1]} : vector<128x8xf32> to vector<32x8xf32>
    %cst_44 = arith.constant dense<0.000000e+00> : vector<8x8xf32>
    %131 = tpu.matmul %129, %130, %cst_44 {dimension_numbers = #tpu.dot_dimension_numbers<[1], [0], [0], [1], [0, 0, 1, 1], [], []>} : vector<8x32xf32>, vector<32x8xf32>, vector<8x8xf32> -> vector<8x8xf32>
    %cst_45 = arith.constant dense<0xFF800000> : vector<8xf32>
    %132 = vector.multi_reduction <maximumf>, %131, %cst_45 [1] : vector<8x8xf32> to vector<8xf32>
    %133 = vector.shape_cast %132 : vector<8xf32> to vector<8x1xf32>
    %134 = vector.broadcast %133 : vector<8x1xf32> to vector<8x8xf32>
    %135 = arith.subf %131, %134 : vector<8x8xf32>
    %136 = math.exp %135 : vector<8x8xf32>
    %cst_46 = arith.constant dense<0.000000e+00> : vector<8xf32>
    %137 = vector.multi_reduction <add>, %136, %cst_46 [1] : vector<8x8xf32> to vector<8xf32>
    %138 = vector.shape_cast %137 : vector<8xf32> to vector<8x1xf32>
    %139 = tpu.reciprocal %138 {approx = true} : vector<8x1xf32> -> vector<8x1xf32>
    %140 = vector.broadcast %139 : vector<8x1xf32> to vector<8x8xf32>
    %141 = arith.mulf %136, %140 : vector<8x8xf32>
    %142 = vector.extract_strided_slice %127 {offsets = [0, 0], sizes = [8, 32], strides = [1, 1]} : vector<8x128xf32> to vector<8x32xf32>
    %cst_47 = arith.constant dense<0.000000e+00> : vector<8x32xf32>
    %143 = tpu.matmul %141, %142, %cst_47 {dimension_numbers = #tpu.dot_dimension_numbers<[1], [0], [0], [1], [0, 0, 1, 1], [], []>} : vector<8x8xf32>, vector<8x32xf32>, vector<8x32xf32> -> vector<8x32xf32>
    %144 = vector.extract_strided_slice %125 {offsets = [0, 32], sizes = [8, 32], strides = [1, 1]} : vector<8x128xf32> to vector<8x32xf32>
    %145 = vector.extract_strided_slice %128 {offsets = [32, 0], sizes = [32, 8], strides = [1, 1]} : vector<128x8xf32> to vector<32x8xf32>
    %cst_48 = arith.constant dense<0.000000e+00> : vector<8x8xf32>
    %146 = tpu.matmul %144, %145, %cst_48 {dimension_numbers = #tpu.dot_dimension_numbers<[1], [0], [0], [1], [0, 0, 1, 1], [], []>} : vector<8x32xf32>, vector<32x8xf32>, vector<8x8xf32> -> vector<8x8xf32>
    %cst_49 = arith.constant dense<0xFF800000> : vector<8xf32>
    %147 = vector.multi_reduction <maximumf>, %146, %cst_49 [1] : vector<8x8xf32> to vector<8xf32>
    %148 = vector.shape_cast %147 : vector<8xf32> to vector<8x1xf32>
    %149 = vector.broadcast %148 : vector<8x1xf32> to vector<8x8xf32>
    %150 = arith.subf %146, %149 : vector<8x8xf32>
    %151 = math.exp %150 : vector<8x8xf32>
    %cst_50 = arith.constant dense<0.000000e+00> : vector<8xf32>
    %152 = vector.multi_reduction <add>, %151, %cst_50 [1] : vector<8x8xf32> to vector<8xf32>
    %153 = vector.shape_cast %152 : vector<8xf32> to vector<8x1xf32>
    %154 = tpu.reciprocal %153 {approx = true} : vector<8x1xf32> -> vector<8x1xf32>
    %155 = vector.broadcast %154 : vector<8x1xf32> to vector<8x8xf32>
    %156 = arith.mulf %151, %155 : vector<8x8xf32>
    %157 = vector.extract_strided_slice %127 {offsets = [0, 32], sizes = [8, 32], strides = [1, 1]} : vector<8x128xf32> to vector<8x32xf32>
    %cst_51 = arith.constant dense<0.000000e+00> : vector<8x32xf32>
    %158 = tpu.matmul %156, %157, %cst_51 {dimension_numbers = #tpu.dot_dimension_numbers<[1], [0], [0], [1], [0, 0, 1, 1], [], []>} : vector<8x8xf32>, vector<8x32xf32>, vector<8x32xf32> -> vector<8x32xf32>
    %159 = vector.extract_strided_slice %125 {offsets = [0, 64], sizes = [8, 32], strides = [1, 1]} : vector<8x128xf32> to vector<8x32xf32>
    %160 = vector.extract_strided_slice %128 {offsets = [64, 0], sizes = [32, 8], strides = [1, 1]} : vector<128x8xf32> to vector<32x8xf32>
    %cst_52 = arith.constant dense<0.000000e+00> : vector<8x8xf32>
    %161 = tpu.matmul %159, %160, %cst_52 {dimension_numbers = #tpu.dot_dimension_numbers<[1], [0], [0], [1], [0, 0, 1, 1], [], []>} : vector<8x32xf32>, vector<32x8xf32>, vector<8x8xf32> -> vector<8x8xf32>
    %cst_53 = arith.constant dense<0xFF800000> : vector<8xf32>
    %162 = vector.multi_reduction <maximumf>, %161, %cst_53 [1] : vector<8x8xf32> to vector<8xf32>
    %163 = vector.shape_cast %162 : vector<8xf32> to vector<8x1xf32>
    %164 = vector.broadcast %163 : vector<8x1xf32> to vector<8x8xf32>
    %165 = arith.subf %161, %164 : vector<8x8xf32>
    %166 = math.exp %165 : vector<8x8xf32>
    %cst_54 = arith.constant dense<0.000000e+00> : vector<8xf32>
    %167 = vector.multi_reduction <add>, %166, %cst_54 [1] : vector<8x8xf32> to vector<8xf32>
    %168 = vector.shape_cast %167 : vector<8xf32> to vector<8x1xf32>
    %169 = tpu.reciprocal %168 {approx = true} : vector<8x1xf32> -> vector<8x1xf32>
    %170 = vector.broadcast %169 : vector<8x1xf32> to vector<8x8xf32>
    %171 = arith.mulf %166, %170 : vector<8x8xf32>
    %172 = vector.extract_strided_slice %127 {offsets = [0, 64], sizes = [8, 32], strides = [1, 1]} : vector<8x128xf32> to vector<8x32xf32>
    %cst_55 = arith.constant dense<0.000000e+00> : vector<8x32xf32>
    %173 = tpu.matmul %171, %172, %cst_55 {dimension_numbers = #tpu.dot_dimension_numbers<[1], [0], [0], [1], [0, 0, 1, 1], [], []>} : vector<8x8xf32>, vector<8x32xf32>, vector<8x32xf32> -> vector<8x32xf32>
    %174 = vector.extract_strided_slice %125 {offsets = [0, 96], sizes = [8, 32], strides = [1, 1]} : vector<8x128xf32> to vector<8x32xf32>
    %175 = vector.extract_strided_slice %128 {offsets = [96, 0], sizes = [32, 8], strides = [1, 1]} : vector<128x8xf32> to vector<32x8xf32>
    %cst_56 = arith.constant dense<0.000000e+00> : vector<8x8xf32>
    %176 = tpu.matmul %174, %175, %cst_56 {dimension_numbers = #tpu.dot_dimension_numbers<[1], [0], [0], [1], [0, 0, 1, 1], [], []>} : vector<8x32xf32>, vector<32x8xf32>, vector<8x8xf32> -> vector<8x8xf32>
    %cst_57 = arith.constant dense<0xFF800000> : vector<8xf32>
    %177 = vector.multi_reduction <maximumf>, %176, %cst_57 [1] : vector<8x8xf32> to vector<8xf32>
    %178 = vector.shape_cast %177 : vector<8xf32> to vector<8x1xf32>
    %179 = vector.broadcast %178 : vector<8x1xf32> to vector<8x8xf32>
    %180 = arith.subf %176, %179 : vector<8x8xf32>
    %181 = math.exp %180 : vector<8x8xf32>
    %cst_58 = arith.constant dense<0.000000e+00> : vector<8xf32>
    %182 = vector.multi_reduction <add>, %181, %cst_58 [1] : vector<8x8xf32> to vector<8xf32>
    %183 = vector.shape_cast %182 : vector<8xf32> to vector<8x1xf32>
    %184 = tpu.reciprocal %183 {approx = true} : vector<8x1xf32> -> vector<8x1xf32>
    %185 = vector.broadcast %184 : vector<8x1xf32> to vector<8x8xf32>
    %186 = arith.mulf %181, %185 : vector<8x8xf32>
    %187 = vector.extract_strided_slice %127 {offsets = [0, 96], sizes = [8, 32], strides = [1, 1]} : vector<8x128xf32> to vector<8x32xf32>
    %cst_59 = arith.constant dense<0.000000e+00> : vector<8x32xf32>
    %188 = tpu.matmul %186, %187, %cst_59 {dimension_numbers = #tpu.dot_dimension_numbers<[1], [0], [0], [1], [0, 0, 1, 1], [], []>} : vector<8x8xf32>, vector<8x32xf32>, vector<8x32xf32> -> vector<8x32xf32>
    %189 = tpu.concatenate %143, %158, %173, %188 in 1 : vector<8x32xf32>, vector<8x32xf32>, vector<8x32xf32>, vector<8x32xf32> -> vector<8x128xf32>
    %190 = tpu.concatenate %124, %189 in 0 : vector<8x128xf32>, vector<8x128xf32> -> vector<16x128xf32>
    %191 = arith.truncf %190 : vector<16x128xf32> to vector<16x128xbf16>
    %c0_60 = arith.constant 0 : index
    %c0_61 = arith.constant 0 : index
    %c0_62 = arith.constant 0 : index
    %192 = vector.load %arg7[%c0_60, %c0_61, %c0_62] : memref<1x128x128xbf16, #tpu.memory_space<vmem>>, vector<1x128x128xbf16>
    %193 = vector.shape_cast %192 : vector<1x128x128xbf16> to vector<128x128xbf16>
    %cst_63 = arith.constant dense<0.000000e+00> : vector<16x128xf32>
    %194 = tpu.matmul %191, %193, %cst_63 {dimension_numbers = #tpu.dot_dimension_numbers<[1], [0], [0], [1], [0, 0, 1, 1], [], []>} : vector<16x128xbf16>, vector<128x128xbf16>, vector<16x128xf32> -> vector<16x128xf32>
    %c0_64 = arith.constant 0 : index
    %c0_65 = arith.constant 0 : index
    %c0_66 = arith.constant 0 : index
    %195 = vector.load %arg8[%c0_64, %c0_65, %c0_66] : memref<1x1x128xf32, #tpu.memory_space<vmem>>, vector<1x1x128xf32>
    %196 = vector.shape_cast %195 : vector<1x1x128xf32> to vector<1x128xf32>
    %197 = vector.broadcast %196 : vector<1x128xf32> to vector<16x128xf32>
    %198 = arith.addf %194, %197 : vector<16x128xf32>
    %199 = arith.addf %3, %198 : vector<16x128xf32>
    %c0_67 = arith.constant 0 : index
    %c0_68 = arith.constant 0 : index
    %c0_69 = arith.constant 0 : index
    %200 = vector.load %arg11[%c0_67, %c0_68, %c0_69] : memref<1x1x128xf32, #tpu.memory_space<vmem>>, vector<1x1x128xf32>
    %201 = vector.shape_cast %200 : vector<1x1x128xf32> to vector<1x128xf32>
    %c0_70 = arith.constant 0 : index
    %c0_71 = arith.constant 0 : index
    %c0_72 = arith.constant 0 : index
    %202 = vector.load %arg12[%c0_70, %c0_71, %c0_72] : memref<1x1x128xf32, #tpu.memory_space<vmem>>, vector<1x1x128xf32>
    %203 = vector.shape_cast %202 : vector<1x1x128xf32> to vector<1x128xf32>
    %cst_73 = arith.constant dense<0.000000e+00> : vector<16xf32>
    %204 = vector.multi_reduction <add>, %199, %cst_73 [1] : vector<16x128xf32> to vector<16xf32>
    %205 = vector.shape_cast %204 : vector<16xf32> to vector<16x1xf32>
    %cst_74 = arith.constant 1.280000e+02 : f32
    %206 = vector.broadcast %cst_74 : f32 to vector<16x1xf32>
    %207 = arith.divf %205, %206 : vector<16x1xf32>
    %208 = vector.broadcast %207 : vector<16x1xf32> to vector<16x128xf32>
    %209 = arith.subf %199, %208 : vector<16x128xf32>
    %210 = arith.mulf %209, %209 : vector<16x128xf32>
    %cst_75 = arith.constant dense<0.000000e+00> : vector<16xf32>
    %211 = vector.multi_reduction <add>, %210, %cst_75 [1] : vector<16x128xf32> to vector<16xf32>
    %212 = vector.shape_cast %211 : vector<16xf32> to vector<16x1xf32>
    %cst_76 = arith.constant 1.280000e+02 : f32
    %213 = vector.broadcast %cst_76 : f32 to vector<16x1xf32>
    %214 = arith.divf %212, %213 : vector<16x1xf32>
    %215 = vector.broadcast %207 : vector<16x1xf32> to vector<16x128xf32>
    %216 = arith.subf %199, %215 : vector<16x128xf32>
    %cst_77 = arith.constant 9.99999974E-6 : f32
    %217 = vector.broadcast %cst_77 : f32 to vector<16x1xf32>
    %218 = arith.addf %214, %217 : vector<16x1xf32>
    %219 = math.rsqrt %218 : vector<16x1xf32>
    %220 = vector.broadcast %219 : vector<16x1xf32> to vector<16x128xf32>
    %221 = arith.mulf %216, %220 : vector<16x128xf32>
    %222 = vector.broadcast %201 : vector<1x128xf32> to vector<16x128xf32>
    %223 = arith.mulf %221, %222 : vector<16x128xf32>
    %224 = vector.broadcast %203 : vector<1x128xf32> to vector<16x128xf32>
    %225 = arith.addf %223, %224 : vector<16x128xf32>
    %226 = arith.truncf %225 : vector<16x128xf32> to vector<16x128xbf16>
    %c0_78 = arith.constant 0 : index
    %c0_79 = arith.constant 0 : index
    %c0_80 = arith.constant 0 : index
    %227 = vector.load %arg13[%c0_78, %c0_79, %c0_80] : memref<1x128x512xbf16, #tpu.memory_space<vmem>>, vector<1x128x512xbf16>
    %228 = vector.shape_cast %227 : vector<1x128x512xbf16> to vector<128x512xbf16>
    %cst_81 = arith.constant dense<0.000000e+00> : vector<16x512xf32>
    %229 = tpu.matmul %226, %228, %cst_81 {dimension_numbers = #tpu.dot_dimension_numbers<[1], [0], [0], [1], [0, 0, 1, 1], [], []>} : vector<16x128xbf16>, vector<128x512xbf16>, vector<16x512xf32> -> vector<16x512xf32>
    %c0_82 = arith.constant 0 : index
    %c0_83 = arith.constant 0 : index
    %c0_84 = arith.constant 0 : index
    %230 = vector.load %arg14[%c0_82, %c0_83, %c0_84] : memref<1x1x512xf32, #tpu.memory_space<vmem>>, vector<1x1x512xf32>
    %231 = vector.shape_cast %230 : vector<1x1x512xf32> to vector<1x512xf32>
    %232 = vector.broadcast %231 : vector<1x512xf32> to vector<16x512xf32>
    %233 = arith.addf %229, %232 : vector<16x512xf32>
    %cst_85 = arith.constant 5.000000e-01 : f32
    %234 = vector.broadcast %cst_85 : f32 to vector<16x512xf32>
    %235 = arith.mulf %234, %233 : vector<16x512xf32>
    %cst_86 = arith.constant 0.707106769 : f32
    %236 = vector.broadcast %cst_86 : f32 to vector<16x512xf32>
    %237 = arith.mulf %233, %236 : vector<16x512xf32>
    %cst_87 = arith.constant 0.000000e+00 : f32
    %238 = vector.broadcast %cst_87 : f32 to vector<16x512xf32>
    %239 = arith.cmpf oge, %237, %238 : vector<16x512xf32>
    %cst_88 = arith.constant 1.000000e+00 : f32
    %cst_89 = arith.constant -1.000000e+00 : f32
    %240 = vector.broadcast %cst_88 : f32 to vector<16x512xf32>
    %241 = vector.broadcast %cst_89 : f32 to vector<16x512xf32>
    %242 = arith.select %239, %240, %241 : vector<16x512xi1>, vector<16x512xf32>
    %243 = math.absf %237 : vector<16x512xf32>
    %cst_90 = arith.constant 0.327591091 : f32
    %244 = vector.broadcast %cst_90 : f32 to vector<16x512xf32>
    %245 = arith.mulf %244, %243 : vector<16x512xf32>
    %cst_91 = arith.constant 1.000000e+00 : f32
    %246 = vector.broadcast %cst_91 : f32 to vector<16x512xf32>
    %247 = arith.addf %246, %245 : vector<16x512xf32>
    %cst_92 = arith.constant 1.000000e+00 : f32
    %248 = vector.broadcast %cst_92 : f32 to vector<16x512xf32>
    %249 = arith.divf %248, %247 : vector<16x512xf32>
    %cst_93 = arith.constant 1.06140542 : f32
    %250 = vector.broadcast %cst_93 : f32 to vector<16x512xf32>
    %251 = arith.mulf %250, %249 : vector<16x512xf32>
    %cst_94 = arith.constant -1.45315206 : f32
    %252 = vector.broadcast %cst_94 : f32 to vector<16x512xf32>
    %253 = arith.addf %251, %252 : vector<16x512xf32>
    %254 = arith.mulf %253, %249 : vector<16x512xf32>
    %cst_95 = arith.constant 1.42141378 : f32
    %255 = vector.broadcast %cst_95 : f32 to vector<16x512xf32>
    %256 = arith.addf %254, %255 : vector<16x512xf32>
    %257 = arith.mulf %256, %249 : vector<16x512xf32>
    %cst_96 = arith.constant -0.284496725 : f32
    %258 = vector.broadcast %cst_96 : f32 to vector<16x512xf32>
    %259 = arith.addf %257, %258 : vector<16x512xf32>
    %260 = arith.mulf %259, %249 : vector<16x512xf32>
    %cst_97 = arith.constant 0.254829586 : f32
    %261 = vector.broadcast %cst_97 : f32 to vector<16x512xf32>
    %262 = arith.addf %260, %261 : vector<16x512xf32>
    %263 = arith.mulf %262, %249 : vector<16x512xf32>
    %cst_98 = arith.constant 0.000000e+00 : f32
    %264 = vector.broadcast %cst_98 : f32 to vector<16x512xf32>
    %265 = arith.subf %264, %243 : vector<16x512xf32>
    %266 = arith.mulf %265, %243 : vector<16x512xf32>
    %267 = math.exp %266 : vector<16x512xf32>
    %268 = arith.mulf %263, %267 : vector<16x512xf32>
    %cst_99 = arith.constant 1.000000e+00 : f32
    %269 = vector.broadcast %cst_99 : f32 to vector<16x512xf32>
    %270 = arith.subf %269, %268 : vector<16x512xf32>
    %271 = arith.mulf %242, %270 : vector<16x512xf32>
    %cst_100 = arith.constant 1.000000e+00 : f32
    %272 = vector.broadcast %cst_100 : f32 to vector<16x512xf32>
    %273 = arith.addf %272, %271 : vector<16x512xf32>
    %274 = arith.mulf %235, %273 : vector<16x512xf32>
    %275 = arith.truncf %274 : vector<16x512xf32> to vector<16x512xbf16>
    %c0_101 = arith.constant 0 : index
    %c0_102 = arith.constant 0 : index
    %c0_103 = arith.constant 0 : index
    %276 = vector.load %arg15[%c0_101, %c0_102, %c0_103] : memref<1x512x128xbf16, #tpu.memory_space<vmem>>, vector<1x512x128xbf16>
    %277 = vector.shape_cast %276 : vector<1x512x128xbf16> to vector<512x128xbf16>
    %cst_104 = arith.constant dense<0.000000e+00> : vector<16x128xf32>
    %278 = tpu.matmul %275, %277, %cst_104 {dimension_numbers = #tpu.dot_dimension_numbers<[1], [0], [0], [1], [0, 0, 1, 1], [], []>} : vector<16x512xbf16>, vector<512x128xbf16>, vector<16x128xf32> -> vector<16x128xf32>
    %c0_105 = arith.constant 0 : index
    %c0_106 = arith.constant 0 : index
    %c0_107 = arith.constant 0 : index
    %279 = vector.load %arg16[%c0_105, %c0_106, %c0_107] : memref<1x1x128xf32, #tpu.memory_space<vmem>>, vector<1x1x128xf32>
    %280 = vector.shape_cast %279 : vector<1x1x128xf32> to vector<1x128xf32>
    %281 = vector.broadcast %280 : vector<1x128xf32> to vector<16x128xf32>
    %282 = arith.addf %278, %281 : vector<16x128xf32>
    %283 = arith.addf %199, %282 : vector<16x128xf32>
    %c0_108 = arith.constant 0 : index
    %c0_109 = arith.constant 0 : index
    %284 = vector.load %arg20[%c0_108, %c0_109] : memref<16x128xf32, #tpu.memory_space<vmem>>, vector<16x128xf32>
    tpu.vector_store %arg20[%c0_108, %c0_109], %283 {strides = array<i32>} : memref<16x128xf32, #tpu.memory_space<vmem>>, vector<16x128xf32>,
    %c2_i32 = arith.constant 2 : i32
    %285 = arith.cmpi eq, %arg0, %c2_i32 : i32
    %286 = arith.extui %285 : i1 to i32
    %c0_i32_110 = arith.constant 0 : i32
    %287 = arith.cmpi ne, %286, %c0_i32_110 : i32
    scf.if %287 {
      %c0_111 = arith.constant 0 : index
      %c0_112 = arith.constant 0 : index
      %288 = vector.load %arg17[%c0_111, %c0_112] : memref<1x128xf32, #tpu.memory_space<vmem>>, vector<1x128xf32>
      %c0_113 = arith.constant 0 : index
      %c0_114 = arith.constant 0 : index
      %289 = vector.load %arg18[%c0_113, %c0_114] : memref<1x128xf32, #tpu.memory_space<vmem>>, vector<1x128xf32>
      %cst_115 = arith.constant dense<0.000000e+00> : vector<16xf32>
      %290 = vector.multi_reduction <add>, %283, %cst_115 [1] : vector<16x128xf32> to vector<16xf32>
      %291 = vector.shape_cast %290 : vector<16xf32> to vector<16x1xf32>
      %cst_116 = arith.constant 1.280000e+02 : f32
      %292 = vector.broadcast %cst_116 : f32 to vector<16x1xf32>
      %293 = arith.divf %291, %292 : vector<16x1xf32>
      %294 = vector.broadcast %293 : vector<16x1xf32> to vector<16x128xf32>
      %295 = arith.subf %283, %294 : vector<16x128xf32>
      %296 = arith.mulf %295, %295 : vector<16x128xf32>
      %cst_117 = arith.constant dense<0.000000e+00> : vector<16xf32>
      %297 = vector.multi_reduction <add>, %296, %cst_117 [1] : vector<16x128xf32> to vector<16xf32>
      %298 = vector.shape_cast %297 : vector<16xf32> to vector<16x1xf32>
      %cst_118 = arith.constant 1.280000e+02 : f32
      %299 = vector.broadcast %cst_118 : f32 to vector<16x1xf32>
      %300 = arith.divf %298, %299 : vector<16x1xf32>
      %301 = vector.broadcast %293 : vector<16x1xf32> to vector<16x128xf32>
      %302 = arith.subf %283, %301 : vector<16x128xf32>
      %cst_119 = arith.constant 9.99999974E-6 : f32
      %303 = vector.broadcast %cst_119 : f32 to vector<16x1xf32>
      %304 = arith.addf %300, %303 : vector<16x1xf32>
      %305 = math.rsqrt %304 : vector<16x1xf32>
      %306 = vector.broadcast %305 : vector<16x1xf32> to vector<16x128xf32>
      %307 = arith.mulf %302, %306 : vector<16x128xf32>
      %308 = vector.broadcast %288 : vector<1x128xf32> to vector<16x128xf32>
      %309 = arith.mulf %307, %308 : vector<16x128xf32>
      %310 = vector.broadcast %289 : vector<1x128xf32> to vector<16x128xf32>
      %311 = arith.addf %309, %310 : vector<16x128xf32>
      %c0_120 = arith.constant 0 : index
      %c0_121 = arith.constant 0 : index
      %312 = vector.load %arg19[%c0_120, %c0_121] : memref<16x128xf32, #tpu.memory_space<vmem>>, vector<16x128xf32>
      tpu.vector_store %arg19[%c0_120, %c0_121], %311 {strides = array<i32>} : memref<16x128xf32, #tpu.memory_space<vmem>>, vector<16x128xf32>,
    } else {
    }
    return
  }
  func.func @transform_0(%arg0: i32) -> (i32, i32) {
    %c0_i32 = arith.constant 0 : i32
    %c0_i32_0 = arith.constant 0 : i32
    %c0_i32_1 = arith.constant 0 : i32
    return %c0_i32, %c0_i32_0 : i32, i32
  }
  func.func @transform_1(%arg0: i32) -> (i32, i32) {
    %c0_i32 = arith.constant 0 : i32
    %c0_i32_0 = arith.constant 0 : i32
    %c0_i32_1 = arith.constant 0 : i32
    return %c0_i32, %c0_i32_0 : i32, i32
  }
  func.func @transform_2(%arg0: i32) -> (i32, i32) {
    %c0_i32 = arith.constant 0 : i32
    %c0_i32_0 = arith.constant 0 : i32
    %c0_i32_1 = arith.constant 0 : i32
    return %c0_i32, %c0_i32_0 : i32, i32
  }
  func.func @transform_3(%arg0: i32) -> (i32, i32) {
    %c0_i32 = arith.constant 0 : i32
    %c0_i32_0 = arith.constant 0 : i32
    %c0_i32_1 = arith.constant 0 : i32
    return %c0_i32, %c0_i32_0 : i32, i32
  }
  func.func @transform_4(%arg0: i32) -> (i32, i32, i32) {
    %c0_i32 = arith.constant 0 : i32
    %c0_i32_0 = arith.constant 0 : i32
    %c0_i32_1 = arith.constant 0 : i32
    return %arg0, %c0_i32, %c0_i32_0 : i32, i32, i32
  }
  func.func @transform_5(%arg0: i32) -> (i32, i32, i32) {
    %c0_i32 = arith.constant 0 : i32
    %c0_i32_0 = arith.constant 0 : i32
    %c0_i32_1 = arith.constant 0 : i32
    return %arg0, %c0_i32, %c0_i32_0 : i32, i32, i32
  }
  func.func @transform_6(%arg0: i32) -> (i32, i32, i32) {
    %c0_i32 = arith.constant 0 : i32
    %c0_i32_0 = arith.constant 0 : i32
    %c0_i32_1 = arith.constant 0 : i32
    return %arg0, %c0_i32, %c0_i32_0 : i32, i32, i32
  }
  func.func @transform_7(%arg0: i32) -> (i32, i32, i32) {
    %c0_i32 = arith.constant 0 : i32
    %c0_i32_0 = arith.constant 0 : i32
    %c0_i32_1 = arith.constant 0 : i32
    return %arg0, %c0_i32, %c0_i32_0 : i32, i32, i32
  }
  func.func @transform_8(%arg0: i32) -> (i32, i32, i32) {
    %c0_i32 = arith.constant 0 : i32
    %c0_i32_0 = arith.constant 0 : i32
    %c0_i32_1 = arith.constant 0 : i32
    return %arg0, %c0_i32, %c0_i32_0 : i32, i32, i32
  }
  func.func @transform_9(%arg0: i32) -> (i32, i32, i32) {
    %c0_i32 = arith.constant 0 : i32
    %c0_i32_0 = arith.constant 0 : i32
    %c0_i32_1 = arith.constant 0 : i32
    return %arg0, %c0_i32, %c0_i32_0 : i32, i32, i32
  }
  func.func @transform_10(%arg0: i32) -> (i32, i32, i32) {
    %c0_i32 = arith.constant 0 : i32
    %c0_i32_0 = arith.constant 0 : i32
    %c0_i32_1 = arith.constant 0 : i32
    return %arg0, %c0_i32, %c0_i32_0 : i32, i32, i32
  }
  func.func @transform_11(%arg0: i32) -> (i32, i32, i32) {
    %c0_i32 = arith.constant 0 : i32
    %c0_i32_0 = arith.constant 0 : i32
    %c0_i32_1 = arith.constant 0 : i32
    return %arg0, %c0_i32, %c0_i32_0 : i32, i32, i32
  }
  func.func @transform_12(%arg0: i32) -> (i32, i32, i32) {
    %c0_i32 = arith.constant 0 : i32
    %c0_i32_0 = arith.constant 0 : i32
    %c0_i32_1 = arith.constant 0 : i32
    return %arg0, %c0_i32, %c0_i32_0 : i32, i32, i32
  }
  func.func @transform_13(%arg0: i32) -> (i32, i32, i32) {
    %c0_i32 = arith.constant 0 : i32
    %c0_i32_0 = arith.constant 0 : i32
    %c0_i32_1 = arith.constant 0 : i32
    return %arg0, %c0_i32, %c0_i32_0 : i32, i32, i32
  }
  func.func @transform_14(%arg0: i32) -> (i32, i32, i32) {
    %c0_i32 = arith.constant 0 : i32
    %c0_i32_0 = arith.constant 0 : i32
    %c0_i32_1 = arith.constant 0 : i32
    return %arg0, %c0_i32, %c0_i32_0 : i32, i32, i32
  }
  func.func @transform_15(%arg0: i32) -> (i32, i32, i32) {
    %c0_i32 = arith.constant 0 : i32
    %c0_i32_0 = arith.constant 0 : i32
    %c0_i32_1 = arith.constant 0 : i32
    return %arg0, %c0_i32, %c0_i32_0 : i32, i32, i32
  }
  func.func @transform_16(%arg0: i32) -> (i32, i32) {
    %c0_i32 = arith.constant 0 : i32
    %c0_i32_0 = arith.constant 0 : i32
    %c0_i32_1 = arith.constant 0 : i32
    return %c0_i32, %c0_i32_0 : i32, i32
  }
  func.func @transform_17(%arg0: i32) -> (i32, i32) {
    %c0_i32 = arith.constant 0 : i32
    %c0_i32_0 = arith.constant 0 : i32
    %c0_i32_1 = arith.constant 0 : i32
    return %c0_i32, %c0_i32_0 : i32, i32
  }
  func.func @transform_18(%arg0: i32) -> (i32, i32) {
    %c0_i32 = arith.constant 0 : i32
    %c0_i32_0 = arith.constant 0 : i32
    %c0_i32_1 = arith.constant 0 : i32
    return %c0_i32, %c0_i32_0 : i32, i32
  }
}

</mosaic_0001>

<bundles_post_ra>
// kernel: esm2_forward.1
= control target key start
LH: loop header
LB: loop body
LE: loop exit
PB: predicated region body
PF: predicated region fallthrough
CT: control target
= control target key end

     0   :  { %s5532_s0 = inlined_call_operand.vmem [shape: f32[16,128], index: 0, kind: input, shape index: {}]   ;;  %s5533_s1 = inlined_call_operand.vmem [shape: f32[16,128], index: 1, kind: input, shape index: {}]   ;;  %s5534_s2 = inlined_call_operand.vmem [shape: f32[16,128], index: 2, kind: input, shape index: {}]   ;;  %s5535_s3 = inlined_call_operand.vmem [shape: f32[16,128], index: 3, kind: input, shape index: {}]   ;;  %s5536_s4 = inlined_call_operand.hbm [shape: bf16[3,128,384], index: 4, kind: input, shape index: {}]   ;;  %s5537_s5 = inlined_call_operand.vmem [shape: f32[3,1,384], index: 5, kind: input, shape index: {}]   ;;  %s5538_s6 = inlined_call_operand.vmem [shape: bf16[3,128,128], index: 6, kind: input, shape index: {}]   ;;  %s5539_s7 = inlined_call_operand.hbm [shape: f32[3,1,128], index: 7, kind: input, shape index: {}]   ;;  %s5540_s8 = inlined_call_operand.vmem [shape: f32[3,1,128], index: 8, kind: input, shape index: {}]   ;;  %s5541_s9 = inlined_call_operand.vmem [shape: f32[3,1,128], index: 9, kind: input, shape index: {}]   ;;  %s5542_s10 = inlined_call_operand.vmem [shape: f32[3,1,128], index: 10, kind: input, shape index: {}]   ;;  %s5543_s11 = inlined_call_operand.vmem [shape: f32[3,1,128], index: 11, kind: input, shape index: {}]   ;;  %s5544_s12 = inlined_call_operand.hbm [shape: bf16[3,128,512], index: 12, kind: input, shape index: {}]   ;;  %s5545_s13 = inlined_call_operand.vmem [shape: f32[3,1,512], index: 13, kind: input, shape index: {}]   ;;  %s5546_s14 = inlined_call_operand.hbm [shape: bf16[3,512,128], index: 14, kind: input, shape index: {}]   ;;  %s5547_s15 = inlined_call_operand.vmem [shape: f32[3,1,128], index: 15, kind: input, shape index: {}]   ;;  %s5548_s16 = inlined_call_operand.vmem [shape: f32[1,128], index: 16, kind: input, shape index: {}]   ;;  %s5549_s17 = inlined_call_operand.vmem [shape: f32[1,128], index: 17, kind: input, shape index: {}]   ;;  %s5550_s18 = inlined_call_operand.vmem [shape: f32[16,128], index: 18, kind: output, shape index: {}]  }
   0x1   :  { %5560 = sst [smem:[#allocation16_spill]] %s5532_s0 }
   0x2   :  { %5561 = sst [smem:[#allocation17_spill]] %s5533_s1 }
   0x3   :  { %5562 = sst [smem:[#allocation18_spill]] %s5534_s2 }
   0x4   :  { %5563 = sst [smem:[#allocation19_spill]] %s5535_s3 }
   0x5   :  { %5564 = sst [smem:[#allocation20_spill]] %s5536_s4 }
   0x6   :  { %5565 = sst [smem:[#allocation21_spill]] %s5537_s5 }
   0x7   :  { %5566 = sst [smem:[#allocation22_spill]] %s5538_s6 }
   0x8   :  { %5567 = sst [smem:[#allocation23_spill]] %s5539_s7 }
   0x9   :  { %5568 = sst [smem:[#allocation24_spill]] %s5544_s12 }
   0xa   :  { %5569 = sst [smem:[#allocation25_spill]] %s5545_s13 }
   0xb   :  { %5570 = sst [smem:[#allocation26_spill]] %s5546_s14 }
   0xc   :  { %5571 = sst [smem:[#allocation27_spill]] %s5548_s16 }
   0xd   :  { %5572 = sst [smem:[#allocation28_spill]] %s5549_s17 }
   0xe   :  { %5573 = sst [smem:[#allocation29_spill]] %s5550_s18 }
   0xf   :  { %23 = vsyncpa [#allocation4], 0 }
  0x10   :  { %25 = vsyncpa [#allocation4 + $0x1], 0 }
  0x11   :  { %26 = vsyncpa [#allocation6], 0 }
  0x12   :  { %28 = vsyncpa [#allocation6 + $0x1], 0 }
  0x13   :  { %29 = vsyncpa [#allocation9], 0 }
  0x14   :  { %31 = vsyncpa [#allocation9 + $0x1], 0  ;;  %s4704_s27 = smov 0   ;;  %s4706_s28 = smov 0  }
  0x15   :  { %s4708_s29 = smov 0   ;;  %s4710_s30 = smov 0  }
  0x16 LB: > { %5574 = sst [smem:[#allocation13_spill]] %s4584_s29  ;;  %s4723_s0 = sadd.s32 4294967295, %s4588_s30   ;;  %s4588_s30 = sphi %s4710_s30, %s5602_s30   ;;  %s4584_s29 = sphi %s4708_s29, %s5604_s29   ;;  %s4580_s28 = sphi %s4706_s28, %s5606_s28   ;;  %s4576_s27 = sphi %s4704_s27, %s5605_s27  }
  0x17   : > { %s4726_s19 = sadd.s32 1, %s4588_s30   ;;  %s128_s20 = sadd.s32 1, %s4584_s29 }
  0x18   : > { %5575 = sst [smem:[#allocation14_spill]] %s4726_s19  ;;  %s125_s1 = ssub.s32 %s4588_s30, %s4726_s19 }
  0x19   : > { %p126_p0 = scmp.eq.s32.totalorder %s125_s1, 0  ;;  %p135_p1 = scmp.ne.s32.totalorder %s4584_s29, %s4580_s28 }
  0x1a   : > { %p136_p2 = scmp.eq.s32.totalorder %s4588_s30, 0  ;;  %p141_p3 = scmp.ne.s32.totalorder %s4580_s28, %s4576_s27 }
  0x1b   : > { %s4736_s21 = scalar_select %p126_p0, %s4584_s29, %s128_s20  }
  0x1c   : > { %p137_p4 = por %p136_p2, %p135_p1  ;;  %p142_p5 = scmp.eq.s32.totalorder %s4723_s0, 0 }
  0x1d   : > { %5576 = sst [smem:[#allocation15_spill]] %s4736_s21  ;;  %p4165_p6 = scmp.lt.s32.totalorder %s4588_s30, 3 }
  0x1e   : > { %p4740_p7 = por %p142_p5, %p141_p3  ;;  %s4745_s2 = sand.u32 1, %s4584_s29  }
  0x1f   : > { %p4747_p8 = pnand %p4165_p6, %p137_p4  ;;  %s568_s24 = sand.u32 1, %s4588_s30  }
  0x20   : > { %s5577_s22 = scalar_select %p4740_p7, 1, 0 }
  0x21   : > { %s3778_s25 = sshll.u32 %s4588_s30, 4  ;;  %s5579_s7 = sld [smem:[#allocation23_spill]] }
  0x22   : > { %s571_s20 = scalar_lea.vmem [#allocation5], %s4745_s2  ;;  %s4762_s29 = scalar_lea.sflag [#allocation6], %s568_s24 }
  0x23   : > { %s578_s21 = sshll.u32 %s571_s20, 4  ;;  %p4768_p11 = pneg %p4747_p8  ;;  %s4759_s21 = int_to_ptr.vmem [resolvable:$true] %s578_s21 }
  0x27   : > { %s4756_s1 = scalar_lea.hbm %s5579_s7, %s3778_s25  ;;  %s4431_s27 = scalar_lea.hbm %s5579_s7, 48 }
  0x28   : > { %s4426_s19 = scalar_lea.hbm %s4756_s1, 16  ;;  %p4432_p0 = scmp.lt.u32.totalorder %s4756_s1, %s5579_s7 }
  0x29   : > { %p4427_p10 = scmp.ne.s32.totalorder %s4756_s1, %s4426_s19  ;;  %p4433_p1 = scmp.lt.u32.totalorder %s4431_s27, %s4426_s19 }
  0x2a   : > { %p4435_p3 = scmp.lt.u32.totalorder %s4426_s19, %s4756_s1 }
  0x2b   : > { %p4429_p12 = pnand %p4768_p11, %p4427_p10  ;;  %p4434_p2 = por %p4433_p1, %p4432_p0 }
  0x2d   : > { %p4430_p13 = pneg %p4429_p12  ;;  %p4436_p4 = por %p4435_p3, %p4434_p2 }
  0x2f   : > { %p4437_p5 = pnand %p4436_p4, %p4430_p13 }
  0x31   : > { %4440 = shalt.err (!%p4437_p5)
}
  0x32   : > { %s4441_s24 = scalar_lea.vmem %s4759_s21, 16  ;;  %s4590_s25 = smov [#allocation5]  }
  0x33   : > { %p4442_p6 = scmp.ne.s32.totalorder %s4759_s21, %s4441_s24  ;;  %s4446_s26 = sshll.u32 %s4590_s25, 4  ;;  %s4447_s26 = int_to_ptr.vmem [resolvable:$false] %s4446_s26 }
  0x34   : > { %s4448_s17 = scalar_lea.vmem %s4447_s26, 32  ;;  %p4449_p9 = scmp.lt.s32.totalorder %s4759_s21, %s4447_s26 }
  0x35   : > { %p4444_p10 = pnand %p4442_p6, %p4768_p11  ;;  %p4450_p7 = scmp.lt.s32.totalorder %s4448_s17, %s4441_s24 }
  0x37   : > { %p4445_p12 = pneg %p4444_p10  ;;  %p4451_p0 = por %p4450_p7, %p4449_p9 }
  0x39   : > { %p4452_p1 = pnand %p4451_p0, %p4445_p12 }
  0x3b   : > { %4455 = shalt.err (!%p4452_p1)
}
  0x3c   : > { %4158 = dma.hbm_to_vmem [thread:$0]  (!%p4747_p8), %s4756_s1, 16, %s4759_s21, %s4762_s29  }
  0x3d   : > { %p662_p13 = scmp.lt.s32.totalorder %s4588_s30, 4  ;;  %s4140_s19 = smul.u32 192, %s4745_s2 }
  0x3e   : > { %p5581_p2 = scmp.ge.s32.totalorder %s4588_s30, 1  ;;  %s4141_s20 = smul.u32 3072, %s4588_s30 }
  0x3f   : > { %s5583_s4 = sld [smem:[#allocation20_spill]]  ;;  %s536_s17 = scalar_lea.vmem [#allocation3], %s4140_s19 }
  0x40   : > { %p4796_p3 = pnand %p5581_p2, %p662_p13  ;;  %s543_s7 = sshll.u32 %s536_s17, 4  ;;  %s4806_s7 = int_to_ptr.vmem [resolvable:$true] %s543_s7 }
  0x41   : > { %s3779_s21 = sshll.u32 %s4745_s2, 8  ;;  %s533_s1 = scalar_lea.sflag [#allocation4], %s4745_s2 }
  0x42   : > { %s5582_s27 = scalar_select %p4796_p3, 1, 0 }
  0x45   : > { %s4804_s26 = scalar_lea.hbm %s5583_s4, %s4141_s20  ;;  %s4461_s20 = scalar_lea.hbm %s5583_s4, 9216 }
  0x46   : > { %s4456_s16 = scalar_lea.hbm %s4804_s26, 3072  ;;  %p4462_p5 = scmp.lt.u32.totalorder %s4804_s26, %s5583_s4 }
  0x47   : > { %p4457_p7 = scmp.ne.s32.totalorder %s4804_s26, %s4456_s16  ;;  %p4463_p6 = scmp.lt.u32.totalorder %s4461_s20, %s4456_s16 }
  0x48   : > { %p4465_p12 = scmp.lt.u32.totalorder %s4456_s16, %s4804_s26 }
  0x49   : > { %p4459_p9 = pnand %p4457_p7, %p4768_p11  ;;  %p4464_p10 = por %p4463_p6, %p4462_p5 }
  0x4b   : > { %p4460_p4 = pneg %p4459_p9  ;;  %p4466_p0 = por %p4465_p12, %p4464_p10 }
  0x4d   : > { %p4467_p1 = pnand %p4466_p0, %p4460_p4 }
  0x4f   : > { %4470 = shalt.err (!%p4467_p1)
}
  0x50   : > { %s4471_s19 = scalar_lea.vmem %s4806_s7, 3072  ;;  %s4591_s3 = smov [#allocation3]  }
  0x51   : > { %p4472_p13 = scmp.ne.s32.totalorder %s4806_s7, %s4471_s19  ;;  %s4476_s13 = sshll.u32 %s4591_s3, 4  ;;  %s4477_s13 = int_to_ptr.vmem [resolvable:$false] %s4476_s13 }
  0x52   : > { %s4478_s17 = scalar_lea.vmem %s4477_s13, 6144  ;;  %p4479_p9 = scmp.lt.s32.totalorder %s4806_s7, %s4477_s13 }
  0x53   : > { %p4474_p2 = pnand %p4472_p13, %p4768_p11  ;;  %p4480_p3 = scmp.lt.s32.totalorder %s4478_s17, %s4471_s19 }
  0x55   : > { %p4475_p7 = pneg %p4474_p2  ;;  %p4481_p5 = por %p4480_p3, %p4479_p9 }
  0x57   : > { %p4482_p6 = pnand %p4481_p5, %p4475_p7 }
  0x59   : > { %4485 = shalt.err (!%p4482_p6)
}
  0x5a   : > { %s4592_s16 = smov 192   ;;  %s4593_s20 = smov 12  }
  0x5b   : > { %4155 = dma.hbm_to_vmem [thread:$0]  (!%p4747_p8), %s4804_s26, 3072, %s4806_s7, %s533_s1, %s4592_s16, %s4592_s16, %s4593_s20  }
  0x5c   : > { %s3923_s24 = sshll.u32 %s4588_s30, 12  ;;  %s5584_s12 = sld [smem:[#allocation24_spill]] }
  0x5d   : > { %s613_s13 = scalar_lea.vmem [#allocation7], %s3779_s21 }
  0x5e   : > { %s620_s17 = sshll.u32 %s613_s13, 4  ;;  %s4843_s17 = int_to_ptr.vmem [resolvable:$true] %s620_s17 }
  0x62   : > { %s4839_s3 = scalar_lea.hbm %s5584_s12, %s3923_s24  ;;  %s4491_s1 = scalar_lea.hbm %s5584_s12, 12288 }
  0x63   : > { %s4486_s4 = scalar_lea.hbm %s4839_s3, 4096  ;;  %p4492_p12 = scmp.lt.u32.totalorder %s4839_s3, %s5584_s12 }
  0x64   : > { %p4487_p3 = scmp.ne.s32.totalorder %s4839_s3, %s4486_s4  ;;  %p4493_p0 = scmp.lt.u32.totalorder %s4491_s1, %s4486_s4 }
  0x65   : > { %p4495_p13 = scmp.lt.u32.totalorder %s4486_s4, %s4839_s3 }
  0x66   : > { %p4489_p4 = pnand %p4487_p3, %p4768_p11  ;;  %p4494_p1 = por %p4493_p0, %p4492_p12 }
  0x68   : > { %p4490_p10 = pneg %p4489_p4  ;;  %p4496_p2 = por %p4495_p13, %p4494_p1 }
  0x6a   : > { %p4497_p7 = pnand %p4496_p2, %p4490_p10 }
  0x6c   : > { %4500 = shalt.err (!%p4497_p7)
}
  0x6d   : > { %s4501_s25 = scalar_lea.vmem %s4843_s17, 4096  ;;  %s4594_s19 = smov [#allocation7]  }
  0x6e   : > { %p4502_p9 = scmp.ne.s32.totalorder %s4843_s17, %s4501_s25  ;;  %s4506_s13 = sshll.u32 %s4594_s19, 4  ;;  %s4507_s13 = int_to_ptr.vmem [resolvable:$false] %s4506_s13 }
  0x6f   : > { %s4508_s7 = scalar_lea.vmem %s4507_s13, 8192  ;;  %p4509_p3 = scmp.lt.s32.totalorder %s4843_s17, %s4507_s13 }
  0x70   : > { %p4504_p5 = pnand %p4502_p9, %p4768_p11  ;;  %p4510_p4 = scmp.lt.s32.totalorder %s4508_s7, %s4501_s25 }
  0x72   : > { %p4505_p6 = pneg %p4504_p5  ;;  %p4511_p12 = por %p4510_p4, %p4509_p3 }
  0x74   : > { %p4512_p0 = pnand %p4511_p12, %p4505_p6 }
  0x76   : > { %4515 = shalt.err (!%p4512_p0)
}
  0x77   : > { %s4595_s4 = smov 256   ;;  %s4596_s26 = smov 16  }
  0x78   : > { %4161 = dma.hbm_to_vmem [thread:$0]  (!%p4747_p8), %s4839_s3, 4096, %s4843_s17, %s4762_s29, %s4595_s4, %s4595_s4, %s4596_s26  }
  0x79   : > { %s5585_s14 = sld [smem:[#allocation26_spill]]  ;;  %s641_s25 = scalar_lea.vmem [#allocation8], %s3779_s21 }
  0x7a   : > { %s648_s19 = sshll.u32 %s641_s25, 4  ;;  %s638_s13 = scalar_lea.sflag [#allocation9], %s4745_s2  ;;  %s4876_s19 = int_to_ptr.vmem [resolvable:$true] %s648_s19 }
  0x7f   : > { %s4872_s20 = scalar_lea.hbm %s5585_s14, %s3923_s24  ;;  %s4521_s24 = scalar_lea.hbm %s5585_s14, 12288 }
  0x80   : > { %s4516_s7 = scalar_lea.hbm %s4872_s20, 4096  ;;  %p4522_p2 = scmp.lt.u32.totalorder %s4872_s20, %s5585_s14 }
  0x81   : > { %p4517_p10 = scmp.ne.s32.totalorder %s4872_s20, %s4516_s7  ;;  %p4523_p7 = scmp.lt.u32.totalorder %s4521_s24, %s4516_s7 }
  0x82   : > { %p4525_p5 = scmp.lt.u32.totalorder %s4516_s7, %s4872_s20 }
  0x83   : > { %p4519_p1 = pnand %p4517_p10, %p4768_p11  ;;  %p4524_p9 = por %p4523_p7, %p4522_p2 }
  0x85   : > { %p4520_p13 = pneg %p4519_p1  ;;  %p4526_p6 = por %p4525_p5, %p4524_p9 }
  0x87   : > { %p4527_p3 = pnand %p4526_p6, %p4520_p13 }
  0x89   : > { %4530 = shalt.err (!%p4527_p3)
}
  0x8a   : > { %s4531_s21 = scalar_lea.vmem %s4876_s19, 4096  ;;  %s4597_s4 = smov [#allocation8]  }
  0x8b   : > { %p4532_p4 = scmp.ne.s32.totalorder %s4876_s19, %s4531_s21  ;;  %s4536_s26 = sshll.u32 %s4597_s4, 4  ;;  %s4537_s26 = int_to_ptr.vmem [resolvable:$false] %s4536_s26 }
  0x8c   : > { %s4538_s1 = scalar_lea.vmem %s4537_s26, 8192  ;;  %p4539_p10 = scmp.lt.s32.totalorder %s4876_s19, %s4537_s26 }
  0x8d   : > { %p4534_p12 = pnand %p4532_p4, %p4768_p11  ;;  %p4540_p1 = scmp.lt.s32.totalorder %s4538_s1, %s4531_s21 }
  0x8f   : > { %p4535_p0 = pneg %p4534_p12  ;;  %p4541_p2 = por %p4540_p1, %p4539_p10 }
  0x91   : > { %p4542_p7 = pnand %p4541_p2, %p4535_p0 }
  0x93   : > { %4545 = shalt.err (!%p4542_p7)
}
  0x94   : > { %s4598_s16 = smov 64   ;;  %s4599_s25 = smov 4  }
  0x95   : > { %4164 = dma.hbm_to_vmem [thread:$0]  (!%p4747_p8), %s4872_s20, 4096, %s4876_s19, %s638_s13, %s4598_s16, %s4598_s16, %s4599_s25  }
  0x96   : > { %p5586_p11 = scmp.ne.s32.totalorder %s5582_s27, 0 }
  0x97   : > { %s4905_s18 = sand.u32 (!%p5586_p11), 1, %s4580_s28   ;;  %p5587_p13 = scmp.ne.s32.totalorder (!%p5586_p11), %s5577_s22, 0 }
  0x98   : > { %666 = sbr.rel (%p5586_p11) target bundleno = 4679 (0x1247), region = 92  ;;  %s669_s29 = scalar_lea.sflag (!%p5586_p11), [#allocation4], %s4905_s18 }
  0x99   : > { %s4142_s7 = smul.u32 (!%p5586_p11), 192, %s4905_s18 }
  0x9b   : > { %s4909_s30 = scalar_lea.vmem (!%p5586_p11), [#allocation3], %s4142_s7 }
  0x9f   : > { %4563 = dma.done.wait (%p5587_p13), %s669_s29, 3072  }
  0xa0   : > { %4565 = vsyncadd (%p5587_p13), %s669_s29, 4294964224  ;;  %s677_s2 = sand.u32 1, %s4723_s0  }
  0xa1   : > { %s678_s23 = scalar_lea.sflag [#allocation6], %s677_s2 }
  0xa2   : > { %4567 = dma.done.wait (%p5587_p13), %s678_s23, 4112  }
  0xa3   : > { %4569 = vsyncadd (%p5587_p13), %s678_s23, 4294963184  ;;  %s3786_s20 = sshll.u32 %s4905_s18, 8  ;;  %s695_s13 = scalar_lea.sflag [#allocation9], %s4905_s18 }
  0xa4   : > { %s4922_s19 = scalar_lea.vmem [#allocation7], %s3786_s20  ;;  %s4925_s24 = scalar_lea.vmem [#allocation8], %s3786_s20 }
  0xa5   : > { %4571 = dma.done.wait (%p5587_p13), %s695_s13, 4096  }
  0xa6   : > { %4573 = vsyncadd (%p5587_p13), %s695_s13, 4294963200  ;;  %p788_p8 = scmp.lt.s32.totalorder %s4723_s0, 2  ;;  %s5588_s6 = sld [smem:[#allocation22_spill]] }
  0xa7   : > { %s5589_s5 = sld [smem:[#allocation21_spill]]  ;;  %s5590_s29 = sld [smem:[#allocation25_spill]] }
  0xa8   : > { %s4933_s3 = scalar_select %p788_p8, %s4723_s0, 2 }
  0xa9   : > { %p3791_p9 = scmp.ne.s32.totalorder %s4723_s0, 0 }
  0xaa   : > { %s4143_s17 = smul.u32 3, %s4933_s3  ;;  %s3925_s21 = sshll.u32 %s4933_s3, 6 }
  0xab   : > { %s802_s13 = scalar_lea.vmem %s5541_s9, %s4933_s3  ;;  %s808_s26 = scalar_lea.vmem %s5543_s11, %s4933_s3 }
  0xac   : > { %s4940_s22 = scalar_lea.vmem %s5588_s6, %s3925_s21  ;;  %s3790_s6 = sshll.u32 %s4933_s3, 2 }
  0xad   : > { %s4949_s2 = scalar_lea.vmem %s5589_s5, %s4143_s17  ;;  %s815_s25 = scalar_lea.vmem %s5547_s15, %s4933_s3 }
  0xae   : > { %s4971_s5 = scalar_lea.vmem %s5590_s29, %s3790_s6  ;;  %820 = sbr.rel (%p3791_p9) target bundleno = 184 (0xb8), region = 112 }
  0xaf   : > { %s5591_s27 = sld [smem:[#allocation16_spill]] (!%p3791_p9) }
  0xb5   : > { %s5592_s20 = smov %s5591_s27  ;;  %v821_v0 = vld [vmem:[%s5591_s27] sm:$0xff] }
  0xb6   : > { %v822_v1 = vld [vmem:[%s5592_s20 + $0x8] sm:$0xff]  ;;  %823 = vst [vmem:[#allocation2] sm:$0xff] %v821_v0 }
  0xb7   : > { %824 = vst [vmem:[#allocation2 + $0x8] sm:$0xff] %v822_v1 }
  0xb8 PF: > { %v4228_v4 = vld [vmem:[%s4909_s30 + $0x4] ss:$12 sps:$4 sm:$0xff]   ;;  %v4230_v5 = vld [vmem:[%s4909_s30] ss:$12 sps:$4 sm:$0xff]   ;;  %v4600_v6 = vmov 0.0   ;;  %v4601_v32 = vmov 0   ;;  %v903_v55 = vlaneseq  ;;  %s5598_s23 = scalar_lea.vmem %s5542_s10, %s4933_s3 }
  0xb9   : > { %4020 = vmatprep.subr.bf16.mxu1 %v4600_v6  ;;  %v4231_v7 = vld [vmem:[%s4909_s30 + $0x8] ss:$12 sps:$4 sm:$0xff]   ;;  %1046 = vmatprep.subr.bf16.mxu0 %v4228_v4  ;;  %v4234_v17 = vld [vmem:[%s4909_s30 + $0x18] ss:$12 sps:$4 sm:$0xff]   ;;  %v4235_v18 = vld [vmem:[%s4909_s30 + $0x20] ss:$12 sps:$4 sm:$0xff]  }
  0xba   : > { %v4232_v8 = vld [vmem:[%s4909_s30 + $0x1c] ss:$12 sps:$4 sm:$0xff]   ;;  %1047 = vmatpush1.bf16.msra.mxu0 %v4230_v5  ;;  %4021 = vmatpush3.bf16.msra.mxu1 %v4231_v7  ;;  %v4236_v19 = vld [vmem:[%s4909_s30 + $0x34] ss:$12 sps:$4 sm:$0xff]   ;;  %v4239_v21 = vld [vmem:[%s4909_s30 + $0x38] ss:$12 sps:$4 sm:$0xff]  }
  0xbb   : > { %1048 = vmatprep.subr.bf16.mxu0 %v4232_v8  ;;  %4022 = vmatprep.subr.bf16.mxu1 %v4600_v6  ;;  %v4238_v20 = vld [vmem:[%s4909_s30 + $0x30] ss:$12 sps:$4 sm:$0xff]   ;;  %v4240_v22 = vld [vmem:[%s4909_s30 + $0x4c] ss:$12 sps:$4 sm:$0xff]   ;;  %v4242_v23 = vld [vmem:[%s4909_s30 + $0x48] ss:$12 sps:$4 sm:$0xff]  }
  0xbc   : > { %v4243_v24 = vld [vmem:[%s4909_s30 + $0x50] ss:$12 sps:$4 sm:$0xff]   ;;  %v4246_v26 = vld [vmem:[%s4909_s30 + $0x60] ss:$12 sps:$4 sm:$0xff]   ;;  %v4247_v27 = vld [vmem:[%s4909_s30 + $0x68] ss:$12 sps:$4 sm:$0xff]   ;;  %1078 = vmatprep.mubr.bf16.mxu0 %v4601_v32 }
  0xbd   : > { %v825_v2 = vld [vmem:[#allocation2] sm:$0xff]  ;;  %v4248_v28 = vld [vmem:[%s4909_s30 + $0x7c] ss:$12 sps:$4 sm:$0xff]   ;;  %v4250_v29 = vld [vmem:[%s4909_s30 + $0x78] ss:$12 sps:$4 sm:$0xff]   ;;  %vm4602_vm0 = vmmov 0  }
  0xbe   : > { %v826_v3 = vld [vmem:[#allocation2 + $0x8] sm:$0xff]  ;;  %829 = vadd.xlane.f32.xlu0 %v825_v2  ;;  %1049 = vmatpush1.bf16.msra.mxu0 %v4234_v17  ;;  %v4244_v25 = vld [vmem:[%s4909_s30 + $0x64] ss:$12 sps:$4 sm:$0xff]   ;;  %v4251_v30 = vld [vmem:[%s4909_s30 + $0x80] ss:$12 sps:$4 sm:$0xff]   ;;  %v5041_v56 = vshrl.u32 %v903_v55, 7 }
  0xbf   : > { %4023 = vmatpush3.bf16.msra.mxu1 %v4235_v18  ;;  %1050 = vmatprep.subr.bf16.mxu0 %v4236_v19  ;;  %v4252_v31 = vld [vmem:[%s4909_s30 + $0x94] ss:$12 sps:$4 sm:$0xff]   ;;  %v4254_v33 = vld [vmem:[%s4909_s30 + $0x90] ss:$12 sps:$4 sm:$0xff]   ;;  %v4255_v34 = vld [vmem:[%s4909_s30 + $0x98] ss:$12 sps:$4 sm:$0xff]  }
  0xc0   : > { %4024 = vmatprep.subr.bf16.mxu1 %v4600_v6  ;;  %4036 = vmatprep.mubr.msk.bf16.mxu1 %vm4602_vm0, %v4600_v6  ;;  %v4256_v35 = vld [vmem:[%s4909_s30 + $0xac] ss:$12 sps:$4 sm:$0xff]   ;;  %v4258_v36 = vld [vmem:[%s4909_s30 + $0xa8] ss:$12 sps:$4 sm:$0xff]   ;;  %v4259_v37 = vld [vmem:[%s4909_s30 + $0xb0] ss:$12 sps:$4 sm:$0xff]   ;;  %s5593_s30 = scalar_lea.vmem %s5540_s8, %s4933_s3 }
  0xc1   : > { %v3792_v46 = vld [vmem:[%s5593_s30] ss:$0 sm:$0xff]  ;;  %v905_v57 = vsub.s32 0, %v5041_v56  ;;  %v909_v58 = vsub.s32 1, %v5041_v56  ;;  %v913_v60 = vsub.s32 2, %v5041_v56  ;;  %s5594_s17 = sld [smem:[#allocation17_spill]] }
  0xc2   : > { %831 = vadd.xlane.f32.xlu0 %v826_v3  ;;  %1051 = vmatpush1.bf16.msra.mxu0 %v4238_v20  ;;  %v3793_v50 = vld [vmem:[%s802_s13] ss:$0 sm:$0xff]  ;;  %s4604_s13 = smov 112   ;;  %s5595_s12 = sld [smem:[#allocation18_spill]]  ;;  %vm1174_vm1 = vcmask 261120   ;;  %vm1251_vm2 = vcmask 64512  }
  0xc3   : > { %4025 = vmatpush3.bf16.msra.mxu1 %v4239_v21  ;;  %1052 = vmatprep.subr.bf16.mxu0 %v4240_v22  ;;  %v901_v59 = vld [vmem:[%s4949_s2] sm:$0x7]  ;;  %s4603_s2 = smov 16   ;;  %s5596_s6 = sld [smem:[#allocation19_spill]]  ;;  %vm1845_vm3 = vcmask 523264   ;;  %vm1847_vm4 = vcmask 785408  }
  0xc4   : > { %4026 = vmatprep.subr.bf16.mxu1 %v4600_v6  ;;  %v906_v61 = vrot.slane %v901_v59, %v905_v57  ;;  %v910_v62 = vrot.slane %v901_v59, %v909_v58  ;;  %v914_v1 = vrot.slane %v901_v59, %v913_v60  ;;  %s4605_s14 = smov 96   ;;  %s4606_s30 = smov 64  }
  0xc5   : > { %s4607_s29 = smov 32   ;;  %p3918_p5 = scmp.ne.s32.totalorder %s4723_s0, 2 }
  0xc6   : > { %1053 = vmatpush1.bf16.msra.mxu0 %v4242_v23  ;;  %s5601_s16 = sld [smem:[#allocation29_spill]] (!%p3918_p5) }
  0xc7   : > { %4027 = vmatpush3.bf16.msra.mxu1 %v4243_v24  ;;  %1054 = vmatprep.subr.bf16.mxu0 %v4244_v25 }
  0xc8   : > { %4028 = vmatprep.subr.bf16.mxu1 %v4600_v6 }
  0xc9   : > { %v1136_v17 = vld [vmem:[%s5596_s6] sm:$0xff] }
  0xca   : > { %1055 = vmatpush1.bf16.msra.mxu0 %v4246_v26 }
  0xcb   : > { %4029 = vmatpush3.bf16.msra.mxu1 %v4247_v27  ;;  %1056 = vmatprep.subr.bf16.mxu0 %v4248_v28 }
  0xcc   : > { %4030 = vmatprep.subr.bf16.mxu1 %v4600_v6 }
  0xce   : > { %1057 = vmatpush1.bf16.msra.mxu0 %v4250_v29 }
  0xcf   : > { %4031 = vmatpush3.bf16.msra.mxu1 %v4251_v30  ;;  %1058 = vmatprep.subr.bf16.mxu0 %v4252_v31 }
  0xd0   : > { %4032 = vmatprep.subr.bf16.mxu1 %v4600_v6 }
  0xd2   : > { %1059 = vmatpush1.bf16.msra.mxu0 %v4254_v33 }
  0xd3   : > { %4033 = vmatpush3.bf16.msra.mxu1 %v4255_v34  ;;  %1060 = vmatprep.subr.bf16.mxu0 %v4256_v35 }
  0xd4   : > { %4034 = vmatprep.subr.bf16.mxu1 %v4600_v6 }
  0xd6   : > { %1061 = vmatpush1.bf16.msra.mxu0 %v4258_v36 }
  0xd7   : > { %4035 = vmatpush3.bf16.msra.mxu1 %v4259_v37  ;;  %4080 = vmatprep.subr.mxu0 %v4600_v6 }
  0xd8   : > { %4040 = vmatprep.subr.mxu1 %v4600_v6 }
 0x14b   : > { %v830_v9 = vpop.xlane.xlu0 %829 }
 0x14c   : > { %v834_v10 = vmul.f32 0.0078125, %v830_v9 }
 0x14e   : > { %v4986_v11 = vsub.f32 %v825_v2, %v834_v10 }
 0x14f   : > { %v832_v12 = vpop.xlane.xlu0 %831 }
 0x150   : > { %v835_v13 = vmul.f32 0.0078125, %v832_v12  ;;  %v838_v14 = vmul.f32 %v4986_v11, %v4986_v11 }
 0x152   : > { %v4990_v15 = vsub.f32 %v826_v3, %v835_v13  ;;  %840 = vadd.xlane.f32.xlu1 %v838_v14 }
 0x154   : > { %v839_v16 = vmul.f32 %v4990_v15, %v4990_v15 }
 0x156   : > { %842 = vadd.xlane.f32.xlu1 %v839_v16  ;;  %v1134_v16 = vld [vmem:[%s5595_s12] sm:$0xff] }
 0x1df   : > { %v841_v38 = vpop.xlane.xlu1 %840 }
 0x1e0   : > { %v844_v39 = vmul.f32 0.0078125, %v841_v38 }
 0x1e2   : > { %v846_v40 = vadd.f32 1e-05, %v844_v39 }
 0x1e3   : > { %v843_v41 = vpop.xlane.xlu1 %842 }
 0x1e4   : > { %4348 = vrsqrt.f32 %v846_v40  ;;  %v845_v42 = vmul.f32 0.0078125, %v843_v41 }
 0x1e6   : > { %v847_v43 = vadd.f32 1e-05, %v845_v42 }
 0x1e8   : > { %4350 = vrsqrt.f32 %v847_v43 }
 0x1ee   : > { %v4349_v44 = vpop.eup %4348 }
 0x1ef   : > { %v850_v45 = vmul.f32 %v4349_v44, %v4986_v11 }
 0x1f1   : > { %v858_v49 = vmul.f32 %v3792_v46, %v850_v45 }
 0x1f2   : > { %v4351_v47 = vpop.eup %4350 }
 0x1f3   : > { %v851_v48 = vmul.f32 %v4351_v47, %v4990_v15  ;;  %v866_v52 = vadd.f32 %v3793_v50, %v858_v49  ;;  %v1132_v15 = vld [vmem:[%s5594_s17] sm:$0xff] }
 0x1f5   : > { %v859_v51 = vmul.f32 %v3792_v46, %v851_v48 }
 0x1f7   : > { %v867_v53 = vadd.f32 %v3793_v50, %v859_v51 }
 0x1f9   : > { %v868_v54 = vpack.c.bf16 %v867_v53, %v866_v52 }
 0x1fb   : > { %1079 = vmatmul.mubr.bf16.vlgmr.msra.gmra.mrb[0].mxu0 %v868_v54  ;;  %4037 = vmatmul.mubr.bf16.vlgmr.msra.gmra.mrb[0].mxu1 %v868_v54 }
 0x1fc   : > { %4042 = vmatprep.mubr.msk.f32.mxu1 %vm4602_vm0, %v4600_v6  ;;  %4082 = vmatprep.mubr.msk.f32.mxu0 %vm4602_vm0, %v4600_v6 }
 0x2ce   : > { %v1080_v63 = vpop.f32.mrb[0].mxu0  ;;  %v1123_v0 = vpop.f32.mrb[0].mxu1 }
 0x2cf   : > { %v1082_v2 = vpop.f32.mrb[1].mxu0  ;;  %v4038_v3 = vpop.f32.mrb[1].mxu1  ;;  %v1081_v4 = vadd.f32 %v1080_v63, %v906_v61  ;;  %v5079_v33 = vadd.f32 %v1123_v0, %v914_v1  ;;  %v1133_v63 = vld [vmem:[%s5594_s17 + $0x8] sm:$0xff] }
 0x2d0   : > { %v1083_v5 = vadd.f32 %v1082_v2, %v910_v62  ;;  %v1084_v7 = vpop.f32.mrb[2].mxu0  ;;  %v1126_v8 = vpop.f32.mrb[2].mxu1  ;;  %v1137_v2 = vld [vmem:[%s5596_s6 + $0x8] sm:$0xff] }
 0x2d1   : > { %v5053_v9 = vadd.f32 %v1084_v7, %v906_v61  ;;  %v5055_v10 = vadd.f32 %v1126_v8, %v914_v1  ;;  %v1086_v11 = vpop.f32.mrb[3].mxu0  ;;  %v4039_v12 = vpop.f32.mrb[3].mxu1  ;;  %v1130_v14 = vmul.f32 0.17677669, %v1081_v4 }
 0x2d2   : > { %v5057_v13 = vadd.f32 %v1086_v11, %v910_v62  ;;  %1160 = vrot.lane.b32.xlu1 %v1083_v5, %s4603_s2  ;;  %1156 = vrot.lane.b32.xlu0 %v1083_v5, %s4604_s13  ;;  %v1164_v20 = vmul.f32 %v1132_v15, %v1083_v5  ;;  %v1135_v62 = vld [vmem:[%s5595_s12 + $0x8] sm:$0xff] }
 0x2d3   : > { %v1146_v27 = vmul.f32 %v1132_v15, %v1130_v14  ;;  %v1131_v52 = vmul.f32 0.17677669, %v5053_v9 }
 0x2d4   : > { %v1165_v4 = vmul.f32 %v1133_v63, %v5057_v13 }
 0x2d5   : > { %v1147_v15 = vmul.f32 %v1133_v63, %v1131_v52 }
 0x2d6   : > { %1138 = vrot.lane.b32.xlu1 %v1130_v14, %s4604_s13 }
 0x2da   : > { %1142 = vrot.lane.b32.xlu1 %v1130_v14, %s4603_s2 }
 0x344   : > { %v1161_v18 = vpop.permute.xlu1 %1160  ;;  %v1157_v19 = vpop.permute.xlu0 %1156 }
 0x345   : > { %v1166_v21 = vmul.f32 %v1157_v19, %v1134_v16  ;;  %v1170_v22 = vmul.f32 %v1161_v18, %v1136_v17 }
 0x347   : > { %v1168_v23 = vadd.f32 %v1166_v21, %v1164_v20 }
 0x348   : > { %v1139_v24 = vpop.permute.xlu1 %1138 }
 0x349   : > { %v5072_v25 = vadd.f32 %v1170_v22, %v1168_v23  ;;  %v1148_v26 = vmul.f32 %v1139_v24, %v1134_v16 }
 0x34b   : > { %4041 = vmatpush3.xpose.msk.msra.mxu1 %vm1174_vm1, %v5072_v25  ;;  %v1150_v29 = vadd.f32 %v1148_v26, %v1146_v27 }
 0x34c   : > { %v1143_v28 = vpop.permute.xlu1 %1142  ;;  %4045 = vmatprep.subr.mxu1 %v4600_v6 }
 0x34d   : > { %v1152_v30 = vmul.f32 %v1143_v28, %v1136_v17 }
 0x34f   : > { %v5077_v31 = vadd.f32 %v1152_v30, %v1150_v29 }
 0x351   : > { %4043 = vmatmul.mubr.msk.f32.vlgmr.msra.gmra.mrb[4].mxu1 %vm1174_vm1, %v5077_v31 }
 0x352   : > { %4046 = vmatpush3.msra.mxu1 %v5079_v33  ;;  %4047 = vmatprep.mubr.msk.f32.mxu1 %vm4602_vm0, %v4600_v6 }
 0x353   : > { %4050 = vmatprep.subr.mxu1 %v4600_v6 }
 0x424   : > { %v1247_v34 = vpop.f32.mrb[4].mxu1 }
 0x425   : > { %v4044_v35 = vpop.f32.mrb[5].mxu1  ;;  %v1252_v36 = vsel %vm1251_vm2, %v1247_v34, -inf }
 0x426   : > { %1253 = vmax.xlane.f32.xlu0 %v1252_v36 }
 0x43c   : > { %1338 = vrot.lane.b32.xlu0 %v5072_v25, %s4605_s14 }
 0x4b3   : > { %v1254_v37 = vpop.xlane.xlu0 %1253 }
 0x4b4   : > { %v1255_v38 = vsub.f32 %v1247_v34, %v1254_v37 }
 0x4b6   : > { %v1256_v39 = vmul.f32 1.442695, %v1255_v38 }
 0x4b7   : > { %v1339_v45 = vpop.permute.xlu0 %1338 }
 0x4b8   : > { %4352 = vpow2.f32 %v1256_v39 }
 0x4c2   : > { %v4353_v40 = vpop.eup %4352 }
 0x4c3   : > { %v1258_v41 = vsel %vm1251_vm2, %v4353_v40, 0.0 }
 0x4c4   : > { %1259 = vadd.xlane.f32.xlu1 %v1258_v41 }
 0x4d5   : > { %1336 = vrot.lane.b32.xlu1 %v5077_v31, %s4605_s14 }
 0x551   : > { %v1260_v42 = vpop.xlane.xlu1 %1259 }
 0x552   : > { %4354 = vrcp.f32 %v1260_v42 }
 0x555   : > { %v1337_v46 = vpop.permute.xlu1 %1336 }
 0x55c   : > { %v4355_v43 = vpop.eup %4354 }
 0x55d   : > { %v1262_v44 = vmul.f32 %v4355_v43, %v4353_v40 }
 0x55f   : > { %4048 = vmatmul.mubr.msk.f32.vlgmr.msra.gmra.mrb[6].mxu1 %vm1251_vm2, %v1262_v44 }
 0x560   : > { %4051 = vmatpush3.xpose.msk.msra.mxu1 %vm1174_vm1, %v1339_v45  ;;  %4052 = vmatprep.mubr.msk.f32.mxu1 %vm4602_vm0, %v4600_v6 }
 0x561   : > { %4055 = vmatprep.subr.mxu1 %v4600_v6 }
 0x563   : > { %4053 = vmatmul.mubr.msk.f32.vlgmr.msra.gmra.mrb[8].mxu1 %vm1174_vm1, %v1337_v46 }
 0x564   : > { %4057 = vmatprep.mubr.msk.f32.mxu1 %vm4602_vm0, %v4600_v6 }
 0x632   : > { %v5101_v47 = vpop.f32.mrb[6].mxu1 }
 0x633   : > { %v4049_v48 = vpop.f32.mrb[7].mxu1 }
 0x636   : > { %v1410_v49 = vpop.f32.mrb[8].mxu1 }
 0x637   : > { %v4054_v50 = vpop.f32.mrb[9].mxu1  ;;  %v1414_v51 = vsel %vm1251_vm2, %v1410_v49, -inf }
 0x638   : > { %1415 = vmax.xlane.f32.xlu0 %v1414_v51 }
 0x64e   : > { %1426 = vrot.lane.b32.xlu0 %v5079_v33, %s4605_s14 }
 0x652   : > { %1502 = vrot.lane.b32.xlu0 %v5077_v31, %s4606_s30 }
 0x656   : > { %1158 = vrot.lane.b32.xlu0 %v5057_v13, %s4604_s13 }
 0x65a   : > { %1162 = vrot.lane.b32.xlu0 %v5057_v13, %s4603_s2 }
 0x65e   : > { %1140 = vrot.lane.b32.xlu0 %v1131_v52, %s4604_s13 }
 0x662   : > { %1144 = vrot.lane.b32.xlu0 %v1131_v52, %s4603_s2 }
 0x6c5   : > { %v1416_v53 = vpop.xlane.xlu0 %1415 }
 0x6c6   : > { %v1417_v54 = vsub.f32 %v1410_v49, %v1416_v53 }
 0x6c8   : > { %v1418_v55 = vmul.f32 1.442695, %v1417_v54 }
 0x6c9   : > { %v1427_v59 = vpop.permute.xlu0 %1426 }
 0x6ca   : > { %4356 = vpow2.f32 %v1418_v55  ;;  %4056 = vmatpush3.msra.mxu1 %v1427_v59 }
 0x6cb   : > { %4060 = vmatprep.subr.mxu1 %v4600_v6 }
 0x6cd   : > { %v1503_v61 = vpop.permute.xlu0 %1502 }
 0x6d1   : > { %v1159_v0 = vpop.permute.xlu0 %1158 }
 0x6d2   : > { %v1167_v1 = vmul.f32 %v1159_v0, %v1135_v62 }
 0x6d4   : > { %v4357_v3 = vpop.eup %4356  ;;  %v1169_v8 = vadd.f32 %v1167_v1, %v1165_v4 }
 0x6d5   : > { %v1163_v5 = vpop.permute.xlu0 %1162  ;;  %v1420_v7 = vsel %vm1251_vm2, %v4357_v3, 0.0 }
 0x6d6   : > { %v1171_v9 = vmul.f32 %v1163_v5, %v1137_v2  ;;  %1421 = vadd.xlane.f32.xlu1 %v1420_v7 }
 0x6d8   : > { %v5127_v11 = vadd.f32 %v1171_v9, %v1169_v8 }
 0x6d9   : > { %v1141_v12 = vpop.permute.xlu0 %1140 }
 0x6da   : > { %v1149_v14 = vmul.f32 %v1141_v12, %v1135_v62  ;;  %4081 = vmatpush3.xpose.msk.msra.mxu0 %vm1174_vm1, %v5127_v11 }
 0x6db   : > { %4090 = vmatprep.subr.mxu0 %v4600_v6 }
 0x6dc   : > { %v1151_v17 = vadd.f32 %v1149_v14, %v1147_v15 }
 0x6dd   : > { %v1145_v16 = vpop.permute.xlu0 %1144 }
 0x6de   : > { %v1153_v18 = vmul.f32 %v1145_v16, %v1137_v2 }
 0x6e0   : > { %v1155_v13 = vadd.f32 %v1153_v18, %v1151_v17 }
 0x6e2   : > { %4083 = vmatmul.mubr.msk.f32.vlgmr.msra.gmra.mrb[4].mxu0 %vm1174_vm1, %v1155_v13 }
 0x6e3   : > { %4092 = vmatprep.mubr.msk.f32.mxu0 %vm4602_vm0, %v4600_v6 }
 0x6e7   : > { %1504 = vrot.lane.b32.xlu1 %v5072_v25, %s4606_s30 }
 0x763   : > { %v1422_v19 = vpop.xlane.xlu1 %1421 }
 0x764   : > { %4358 = vrcp.f32 %v1422_v19 }
 0x767   : > { %v1505_v22 = vpop.permute.xlu1 %1504 }
 0x76e   : > { %v4359_v20 = vpop.eup %4358 }
 0x76f   : > { %v1424_v21 = vmul.f32 %v4359_v20, %v4357_v3 }
 0x771   : > { %4058 = vmatmul.mubr.msk.f32.vlgmr.msra.gmra.mrb[10].mxu1 %vm1251_vm2, %v1424_v21 }
 0x772   : > { %4061 = vmatpush3.xpose.msk.msra.mxu1 %vm1174_vm1, %v1505_v22  ;;  %4062 = vmatprep.mubr.msk.f32.mxu1 %vm4602_vm0, %v4600_v6 }
 0x773   : > { %4065 = vmatprep.subr.mxu1 %v4600_v6 }
 0x775   : > { %4063 = vmatmul.mubr.msk.f32.vlgmr.msra.gmra.mrb[12].mxu1 %vm1174_vm1, %v1503_v61 }
 0x776   : > { %4067 = vmatprep.mubr.msk.f32.mxu1 %vm4602_vm0, %v4600_v6 }
 0x7b5   : > { %v5145_v23 = vpop.f32.mrb[4].mxu0 }
 0x7b6   : > { %v4084_v24 = vpop.f32.mrb[5].mxu0  ;;  %v1925_v34 = vsel %vm1251_vm2, %v5145_v23, -inf }
 0x844   : > { %v5147_v26 = vpop.f32.mrb[10].mxu1 }
 0x845   : > { %v4059_v27 = vpop.f32.mrb[11].mxu1 }
 0x848   : > { %v1576_v28 = vpop.f32.mrb[12].mxu1 }
 0x849   : > { %v4064_v29 = vpop.f32.mrb[13].mxu1  ;;  %v1580_v30 = vsel %vm1251_vm2, %v1576_v28, -inf }
 0x84a   : > { %1581 = vmax.xlane.f32.xlu1 %v1580_v30 }
 0x85b   : > { %1591 = vrot.lane.b32.xlu1 %v5079_v33, %s4606_s30 }
 0x85f   : > { %1667 = vrot.lane.b32.xlu1 %v5077_v31, %s4607_s29 }
 0x863   : > { %2011 = vrot.lane.b32.xlu1 %v5127_v11, %s4605_s14 }
 0x867   : > { %2009 = vrot.lane.b32.xlu1 %v1155_v13, %s4605_s14 }
 0x86b   : > { %2177 = vrot.lane.b32.xlu1 %v5127_v11, %s4606_s30 }
 0x86f   : > { %2175 = vrot.lane.b32.xlu1 %v1155_v13, %s4606_s30 }
 0x873   : > { %2340 = vrot.lane.b32.xlu1 %v1155_v13, %s4607_s29 }
 0x897   : > { %1926 = vmax.xlane.f32.xlu1 %v1925_v34 }
 0x8d7   : > { %v1582_v35 = vpop.xlane.xlu1 %1581 }
 0x8d8   : > { %v1583_v36 = vsub.f32 %v1576_v28, %v1582_v35 }
 0x8da   : > { %v1584_v37 = vmul.f32 1.442695, %v1583_v36 }
 0x8db   : > { %v1592_v31 = vpop.permute.xlu1 %1591 }
 0x8dc   : > { %4360 = vpow2.f32 %v1584_v37  ;;  %4066 = vmatpush3.msra.mxu1 %v1592_v31 }
 0x8dd   : > { %4070 = vmatprep.subr.mxu1 %v4600_v6 }
 0x8df   : > { %v1668_v38 = vpop.permute.xlu1 %1667 }
 0x8e3   : > { %v2012_v39 = vpop.permute.xlu1 %2011 }
 0x8e4   : > { %4091 = vmatpush3.xpose.msk.msra.mxu0 %vm1174_vm1, %v2012_v39 }
 0x8e5   : > { %4100 = vmatprep.subr.mxu0 %v4600_v6 }
 0x8e6   : > { %v4361_v40 = vpop.eup %4360 }
 0x8e7   : > { %v2010_v41 = vpop.permute.xlu1 %2009  ;;  %v1586_v42 = vsel %vm1251_vm2, %v4361_v40, 0.0 }
 0x8e8   : > { %1587 = vadd.xlane.f32.xlu0 %v1586_v42  ;;  %4093 = vmatmul.mubr.msk.f32.vlgmr.msra.gmra.mrb[6].mxu0 %vm1174_vm1, %v2010_v41 }
 0x8e9   : > { %4102 = vmatprep.mubr.msk.f32.mxu0 %vm4602_vm0, %v4600_v6 }
 0x8eb   : > { %v2178_v43 = vpop.permute.xlu1 %2177 }
 0x8ec   : > { %4101 = vmatpush3.xpose.msk.msra.mxu0 %vm1174_vm1, %v2178_v43 }
 0x8ed   : > { %4110 = vmatprep.subr.mxu0 %v4600_v6 }
 0x8ef   : > { %v2176_v44 = vpop.permute.xlu1 %2175 }
 0x8f0   : > { %4103 = vmatmul.mubr.msk.f32.vlgmr.msra.gmra.mrb[8].mxu0 %vm1174_vm1, %v2176_v44 }
 0x8f1   : > { %4112 = vmatprep.mubr.msk.f32.mxu0 %vm4602_vm0, %v4600_v6 }
 0x8f3   : > { %v2341_v50 = vpop.permute.xlu1 %2340 }
 0x8fe   : > { %1669 = vrot.lane.b32.xlu0 %v5072_v25, %s4607_s29 }
 0x902   : > { %2342 = vrot.lane.b32.xlu0 %v5127_v11, %s4607_s29 }
 0x924   : > { %v1927_v55 = vpop.xlane.xlu1 %1926 }
 0x925   : > { %v1928_v62 = vsub.f32 %v5145_v23, %v1927_v55  ;;  %v4262_v55 = vld [vmem:[%s4940_s22 + $0x10] sm:$0xff]  }
 0x927   : > { %v1929_v1 = vmul.f32 1.442695, %v1928_v62  ;;  %v4265_v62 = vld [vmem:[%s4940_s22 + $0x28] sm:$0xff]  }
 0x975   : > { %v1588_v45 = vpop.xlane.xlu0 %1587 }
 0x976   : > { %4362 = vrcp.f32 %v1588_v45 }
 0x977   : > { %4364 = vpow2.f32 %v1929_v1 }
 0x979   : > { %v1670_v46 = vpop.permute.xlu0 %1669 }
 0x97d   : > { %v2343_v48 = vpop.permute.xlu0 %2342 }
 0x97e   : > { %4111 = vmatpush3.xpose.msk.msra.mxu0 %vm1174_vm1, %v2343_v48 }
 0x97f   : > { %4120 = vmatprep.subr.bf16.mxu0 %v4600_v6 }
 0x980   : > { %v4363_v49 = vpop.eup %4362 }
 0x981   : > { %v1590_v51 = vmul.f32 %v4363_v49, %v4361_v40  ;;  %4113 = vmatmul.mubr.msk.f32.vlgmr.msra.gmra.mrb[10].mxu0 %vm1174_vm1, %v2341_v50  ;;  %v4365_v9 = vpop.eup %4364 }
 0x982   : > { %4136 = vmatprep.mubr.msk.bf16.mxu0 %vm4602_vm0, %v4600_v6  ;;  %v1931_v11 = vsel %vm1251_vm2, %v4365_v9, 0.0 }
 0x983   : > { %4068 = vmatmul.mubr.msk.f32.vlgmr.msra.gmra.mrb[14].mxu1 %vm1251_vm2, %v1590_v51 }
 0x984   : > { %4071 = vmatpush3.xpose.msk.msra.mxu1 %vm1174_vm1, %v1670_v46  ;;  %4072 = vmatprep.mubr.msk.f32.mxu1 %vm4602_vm0, %v4600_v6 }
 0x985   : > { %4075 = vmatprep.subr.mxu1 %v4600_v6 }
 0x987   : > { %4073 = vmatmul.mubr.msk.f32.vlgmr.msra.gmra.mrb[16].mxu1 %vm1174_vm1, %v1668_v38 }
 0x988   : > { %4077 = vmatprep.mubr.msk.f32.mxu1 %vm4602_vm0, %v4600_v6 }
 0x9bb   : > { %v2083_v25 = vpop.f32.mrb[6].mxu0 }
 0x9bc   : > { %v4094_v52 = vpop.f32.mrb[7].mxu0  ;;  %v2087_v5 = vsel %vm1251_vm2, %v2083_v25, -inf }
 0x9c3   : > { %v2249_v53 = vpop.f32.mrb[8].mxu0 }
 0x9c4   : > { %v4104_v54 = vpop.f32.mrb[9].mxu0  ;;  %v2253_v7 = vsel %vm1251_vm2, %v2249_v53, -inf }
 0x9c5   : > { %v4261_v54 = vld [vmem:[%s4940_s22 + $0x8] sm:$0xff]  }
 0xa54   : > { %v2414_v59 = vpop.f32.mrb[10].mxu0 }
 0xa55   : > { %v4114_v61 = vpop.f32.mrb[11].mxu0  ;;  %v2418_v8 = vsel %vm1251_vm2, %v2414_v59, -inf }
 0xa56   : > { %v5193_v63 = vpop.f32.mrb[14].mxu1  ;;  %v4264_v61 = vld [vmem:[%s4940_s22 + $0x20] sm:$0xff]  }
 0xa57   : > { %v4069_v0 = vpop.f32.mrb[15].mxu1 }
 0xa5a   : > { %v1741_v2 = vpop.f32.mrb[16].mxu1 }
 0xa5b   : > { %v4074_v3 = vpop.f32.mrb[17].mxu1  ;;  %v1745_v4 = vsel %vm1251_vm2, %v1741_v2, -inf }
 0xa5c   : > { %1746 = vmax.xlane.f32.xlu0 %v1745_v4 }
 0xa60   : > { %2088 = vmax.xlane.f32.xlu0 %v2087_v5  ;;  %v4267_v5 = vld [vmem:[%s4940_s22 + $0x38] sm:$0xff]  }
 0xa64   : > { %2254 = vmax.xlane.f32.xlu0 %v2253_v7 }
 0xa68   : > { %2419 = vmax.xlane.f32.xlu0 %v2418_v8 }
 0xa6c   : > { %1932 = vadd.xlane.f32.xlu0 %v1931_v11 }
 0xae9   : > { %v1747_v12 = vpop.xlane.xlu0 %1746 }
 0xaea   : > { %v1748_v13 = vsub.f32 %v1741_v2, %v1747_v12  ;;  %v4266_v2 = vld [vmem:[%s4940_s22 + $0x30] sm:$0xff]  }
 0xaec   : > { %v1749_v22 = vmul.f32 1.442695, %v1748_v13 }
 0xaed   : > { %v2089_v14 = vpop.xlane.xlu0 %2088 }
 0xaee   : > { %v2090_v15 = vsub.f32 %v2083_v25, %v2089_v14 }
 0xaf0   : > { %v2091_v16 = vmul.f32 1.442695, %v2090_v15 }
 0xaf1   : > { %v2255_v17 = vpop.xlane.xlu0 %2254 }
 0xaf2   : > { %4366 = vpow2.f32 %v2091_v16  ;;  %v2256_v18 = vsub.f32 %v2249_v53, %v2255_v17  ;;  %v4260_v53 = vld [vmem:[%s4940_s22] sm:$0xff]  }
 0xaf3   : > { %4121 = vmatpush3.bf16.msra.mxu0 %v4260_v53 }
 0xaf4   : > { %v2257_v19 = vmul.f32 1.442695, %v2256_v18  ;;  %4122 = vmatprep.subr.bf16.mxu0 %v4600_v6 }
 0xaf5   : > { %v2420_v20 = vpop.xlane.xlu0 %2419 }
 0xaf6   : > { %4368 = vpow2.f32 %v2257_v19  ;;  %v2421_v21 = vsub.f32 %v2414_v59, %v2420_v20  ;;  %v4263_v59 = vld [vmem:[%s4940_s22 + $0x18] sm:$0xff]   ;;  %s5597_s22 = scalar_lea.vmem [#allocation5], %s4905_s18 }
 0xaf7   : > { %4123 = vmatpush3.bf16.msra.mxu0 %v4261_v54 }
 0xaf8   : > { %v2422_v23 = vmul.f32 1.442695, %v2421_v21  ;;  %4124 = vmatprep.subr.bf16.mxu0 %v4600_v6 }
 0xaf9   : > { %v1933_v37 = vpop.xlane.xlu0 %1932 }
 0xafa   : > { %4370 = vpow2.f32 %v2422_v23 }
 0xafb   : > { %4372 = vpow2.f32 %v1749_v22  ;;  %4125 = vmatpush3.bf16.msra.mxu0 %v4262_v55 }
 0xafc   : > { %v4367_v24 = vpop.eup %4366  ;;  %4126 = vmatprep.subr.bf16.mxu0 %v4600_v6 }
 0xafd   : > { %v2093_v27 = vsel %vm1251_vm2, %v4367_v24, 0.0 }
 0xafe   : > { %2094 = vadd.xlane.f32.xlu1 %v2093_v27 }
 0xaff   : > { %4127 = vmatpush3.bf16.msra.mxu0 %v4263_v59 }
 0xb00   : > { %v4369_v28 = vpop.eup %4368  ;;  %4128 = vmatprep.subr.bf16.mxu0 %v4600_v6 }
 0xb01   : > { %v2259_v29 = vsel %vm1251_vm2, %v4369_v28, 0.0 }
 0xb02   : > { %2260 = vadd.xlane.f32.xlu0 %v2259_v29 }
 0xb03   : > { %4129 = vmatpush3.bf16.msra.mxu0 %v4264_v61  ;;  %v4282_v61 = vld [vmem:[%s4922_s19 + $0x44] ss:$16 sps:$4 sm:$0xff]  }
 0xb04   : > { %v4371_v30 = vpop.eup %4370  ;;  %4130 = vmatprep.subr.bf16.mxu0 %v4600_v6 }
 0xb05   : > { %v2424_v34 = vsel %vm1251_vm2, %v4371_v30, 0.0  ;;  %v4373_v35 = vpop.eup %4372 }
 0xb06   : > { %2425 = vadd.xlane.f32.xlu1 %v2424_v34  ;;  %v1751_v36 = vsel %vm1251_vm2, %v4373_v35, 0.0 }
 0xb07   : > { %4131 = vmatpush3.bf16.msra.mxu0 %v4265_v62  ;;  %v4285_v62 = vld [vmem:[%s4922_s19 + $0x4c] ss:$16 sps:$4 sm:$0xff]  }
 0xb08   : > { %4132 = vmatprep.subr.bf16.mxu0 %v4600_v6 }
 0xb0a   : > { %1752 = vadd.xlane.f32.xlu1 %v1751_v36 }
 0xb0b   : > { %4133 = vmatpush3.bf16.msra.mxu0 %v4266_v2  ;;  %v4288_v2 = vld [vmem:[%s4922_s19 + $0x64] ss:$16 sps:$4 sm:$0xff]  }
 0xb0c   : > { %4134 = vmatprep.subr.bf16.mxu0 %v4600_v6 }
 0xb0f   : > { %4135 = vmatpush3.bf16.msra.mxu0 %v4267_v5  ;;  %v4289_v5 = vld [vmem:[%s4922_s19 + $0x68] ss:$16 sps:$4 sm:$0xff]  }
 0xb18   : > { %1756 = vrot.lane.b32.xlu0 %v5079_v33, %s4607_s29 }
 0xb1b   : > { %2099 = vrot.lane.b32.xlu1 %v5055_v10, %s4605_s14 }
 0xb1f   : > { %2264 = vrot.lane.b32.xlu1 %v5055_v10, %s4606_s30 }
 0xb23   : > { %2429 = vrot.lane.b32.xlu1 %v5055_v10, %s4607_s29 }
 0xb8b   : > { %v2095_v31 = vpop.xlane.xlu1 %2094 }
 0xb8f   : > { %v2261_v38 = vpop.xlane.xlu0 %2260 }
 0xb93   : > { %v2426_v39 = vpop.xlane.xlu1 %2425  ;;  %v1757_v40 = vpop.permute.xlu0 %1756 }
 0xb94   : > { %4076 = vmatpush3.msra.mxu1 %v1757_v40 }
 0xb95   : > { %4085 = vmatprep.subr.mxu1 %v4600_v6 }
 0xb97   : > { %v1753_v41 = vpop.xlane.xlu1 %1752 }
 0xb98   : > { %4374 = vrcp.f32 %v1753_v41 }
 0xb99   : > { %4376 = vrcp.f32 %v1933_v37 }
 0xb9a   : > { %4378 = vrcp.f32 %v2095_v31 }
 0xb9b   : > { %4380 = vrcp.f32 %v2261_v38  ;;  %v2100_v44 = vpop.permute.xlu1 %2099  ;;  %v4420_v38 = vld [vmem:[#allocation2] sm:$0xff] }
 0xb9c   : > { %4382 = vrcp.f32 %v2426_v39 }
 0xb9f   : > { %v2265_v49 = vpop.permute.xlu1 %2264 }
 0xba2   : > { %v4375_v33 = vpop.eup %4374 }
 0xba3   : > { %v1755_v42 = vmul.f32 %v4375_v33, %v4373_v35  ;;  %v4377_v43 = vpop.eup %4376  ;;  %v2430_v25 = vpop.permute.xlu1 %2429  ;;  %v3842_v35 = vld [vmem:[%s5597_s22] ss:$0 sm:$0xff]  ;;  %v4421_v33 = vld [vmem:[#allocation2 + $0x8] sm:$0xff] }
 0xba4   : > { %v1935_v45 = vmul.f32 %v4377_v43, %v4365_v9  ;;  %v4379_v46 = vpop.eup %4378  ;;  %v4270_v43 = vld [vmem:[%s4922_s19 + $0x4] ss:$16 sps:$4 sm:$0xff]  }
 0xba5   : > { %4078 = vmatmul.mubr.msk.f32.vlgmr.msra.gmra.mrb[18].mxu1 %vm1251_vm2, %v1755_v42  ;;  %v2097_v48 = vmul.f32 %v4379_v46, %v4367_v24  ;;  %v4381_v50 = vpop.eup %4380  ;;  %v4276_v46 = vld [vmem:[%s4922_s19 + $0x24] ss:$16 sps:$4 sm:$0xff]  }
 0xba6   : > { %4086 = vmatpush3.msra.mxu1 %v5055_v10  ;;  %4087 = vmatprep.mubr.msk.f32.mxu1 %vm4602_vm0, %v4600_v6  ;;  %v2263_v10 = vmul.f32 %v4381_v50, %v4369_v28  ;;  %v4383_v51 = vpop.eup %4382  ;;  %v4277_v50 = vld [vmem:[%s4922_s19 + $0x28] ss:$16 sps:$4 sm:$0xff]  }
 0xba7   : > { %4095 = vmatprep.subr.mxu1 %v4600_v6  ;;  %v2428_v52 = vmul.f32 %v4383_v51, %v4371_v30 }
 0xba9   : > { %4088 = vmatmul.mubr.msk.f32.vlgmr.msra.gmra.mrb[20].mxu1 %vm1251_vm2, %v1935_v45  ;;  %v4273_v45 = vld [vmem:[%s4922_s19 + $0xc] ss:$16 sps:$4 sm:$0xff]  }
 0xbaa   : > { %4096 = vmatpush3.msra.mxu1 %v2100_v44  ;;  %4097 = vmatprep.mubr.msk.f32.mxu1 %vm4602_vm0, %v4600_v6  ;;  %v4271_v44 = vld [vmem:[%s4922_s19 + $0x8] ss:$16 sps:$4 sm:$0xff]  }
 0xbab   : > { %4105 = vmatprep.subr.mxu1 %v4600_v6  ;;  %2933 = vmatprep.subr.bf16.mxu0 %v4273_v45  ;;  %v4320_v45 = vld [vmem:[%s4925_s24 + $0x48] sm:$0xff]  }
 0xbad   : > { %4098 = vmatmul.mubr.msk.f32.vlgmr.msra.gmra.mrb[22].mxu1 %vm1251_vm2, %v2097_v48  ;;  %v4279_v48 = vld [vmem:[%s4922_s19 + $0x2c] ss:$16 sps:$4 sm:$0xff]  }
 0xbae   : > { %4106 = vmatpush3.msra.mxu1 %v2265_v49  ;;  %4107 = vmatprep.mubr.msk.f32.mxu1 %vm4602_vm0, %v4600_v6  ;;  %v4274_v49 = vld [vmem:[%s4922_s19 + $0x20] ss:$16 sps:$4 sm:$0xff]  }
 0xbaf   : > { %4115 = vmatprep.subr.mxu1 %v4600_v6 }
 0xbb1   : > { %4108 = vmatmul.mubr.msk.f32.vlgmr.msra.gmra.mrb[24].mxu1 %vm1251_vm2, %v2263_v10 }
 0xbb2   : > { %4116 = vmatpush3.msra.mxu1 %v2430_v25  ;;  %4117 = vmatprep.mubr.msk.f32.mxu1 %vm4602_vm0, %v4600_v6 }
 0xbb3   : > { %2890 = vmatprep.subr.bf16.mxu1 %v4270_v43  ;;  %v4318_v43 = vld [vmem:[%s4925_s24] sm:$0xff]  }
 0xbb5   : > { %4118 = vmatmul.mubr.msk.f32.vlgmr.msra.gmra.mrb[26].mxu1 %vm1251_vm2, %v2428_v52 }
 0xbb6   : > { %2922 = vmatprep.mubr.bf16.mxu1 %v4601_v32 }
 0xc78   : > { %v1828_v0 = vpop.f32.mrb[18].mxu1 }
 0xc79   : > { %v4079_v1 = vpop.f32.mrb[19].mxu1 }
 0xc7a   : > { %v4283_v1 = vld [vmem:[%s4922_s19 + $0x48] ss:$16 sps:$4 sm:$0xff]  }
 0xc7c   : > { %v2005_v3 = vpop.f32.mrb[20].mxu1 }
 0xc7d   : > { %v4089_v4 = vpop.f32.mrb[21].mxu1 }
 0xc7e   : > { %v4286_v4 = vld [vmem:[%s4922_s19 + $0x60] ss:$16 sps:$4 sm:$0xff]  }
 0xc80   : > { %v2171_v7 = vpop.f32.mrb[22].mxu1 }
 0xc81   : > { %v4213_v8 = vpack.i.bf16 %v2171_v7, %v5147_v26  ;;  %v4099_v9 = vpop.f32.mrb[23].mxu1  ;;  %v4294_v7 = vld [vmem:[%s4922_s19 + $0x84] ss:$16 sps:$4 sm:$0xff]  }
 0xc82   : > { %v4292_v9 = vld [vmem:[%s4922_s19 + $0x80] ss:$16 sps:$4 sm:$0xff]  }
 0xc83   : > { %4214 = vrot.lane.b32.xlu0 %v4213_v8, %s4607_s29  ;;  %v4297_v8 = vld [vmem:[%s4922_s19 + $0x8c] ss:$16 sps:$4 sm:$0xff]  }
 0xc84   : > { %v2336_v11 = vpop.f32.mrb[24].mxu1 }
 0xc85   : > { %v4218_v12 = vpack.i.bf16 %v2336_v11, %v5193_v63  ;;  %v4109_v14 = vpop.f32.mrb[25].mxu1  ;;  %v4295_v11 = vld [vmem:[%s4922_s19 + $0x88] ss:$16 sps:$4 sm:$0xff]  }
 0xc86   : > { %v4303_v14 = vld [vmem:[%s4922_s19 + $0xac] ss:$16 sps:$4 sm:$0xff]  }
 0xc87   : > { %4219 = vrot.lane.b32.xlu1 %v4218_v12, %s4606_s30  ;;  %v4300_v12 = vld [vmem:[%s4922_s19 + $0xa4] ss:$16 sps:$4 sm:$0xff]   ;;  %s5600_s30 = sld [smem:[#allocation28_spill]] (!%p3918_p5) }
 0xc88   : > { %v2501_v15 = vpop.f32.mrb[26].mxu1 }
 0xc89   : > { %v4223_v16 = vpack.i.bf16 %v2501_v15, %v1828_v0  ;;  %v4119_v17 = vpop.f32.mrb[27].mxu1  ;;  %v4280_v0 = vld [vmem:[%s4922_s19 + $0x40] ss:$16 sps:$4 sm:$0xff]  }
 0xc8a   : > { %v4298_v15 = vld [vmem:[%s4922_s19 + $0xa0] ss:$16 sps:$4 sm:$0xff]   ;;  %v4306_v17 = vld [vmem:[%s4922_s19 + $0xc4] ss:$16 sps:$4 sm:$0xff]  }
 0xc8b   : > { %4224 = vrot.lane.b32.xlu0 %v4223_v16, %s4605_s14  ;;  %v4301_v16 = vld [vmem:[%s4922_s19 + $0xa8] ss:$16 sps:$4 sm:$0xff]  }
 0xcf5   : > { %v4215_v6 = vpop.permute.xlu0 %4214 }
 0xcf6   : > { %v4217_v13 = vunpack.i.h.bf16 %v4215_v6  ;;  %v4216_v19 = vunpack.i.l.bf16 %v4215_v6  ;;  %v4309_v6 = vld [vmem:[%s4922_s19 + $0xcc] ss:$16 sps:$4 sm:$0xff]  }
 0xcf8   : > { %v2517_v63 = vsel %vm1174_vm1, %v2005_v3, %v4217_v13  ;;  %v1844_v22 = vsel %vm1174_vm1, %v5101_v47, %v4216_v19  ;;  %v4291_v3 = vld [vmem:[%s4922_s19 + $0x6c] ss:$16 sps:$4 sm:$0xff]   ;;  %v4307_v13 = vld [vmem:[%s4922_s19 + $0xc8] ss:$16 sps:$4 sm:$0xff]   ;;  %v4312_v19 = vld [vmem:[%s4922_s19 + $0xe4] ss:$16 sps:$4 sm:$0xff]  }
 0xcf9   : > { %v4220_v18 = vpop.permute.xlu1 %4219 }
 0xcfa   : > { %v4222_v26 = vunpack.i.h.bf16 %v4220_v18  ;;  %v4221_v20 = vunpack.i.l.bf16 %v4220_v18  ;;  %v4304_v18 = vld [vmem:[%s4922_s19 + $0xc0] ss:$16 sps:$4 sm:$0xff]  }
 0xcfc   : > { %v2518_v27 = vsel %vm1845_vm3, %v2517_v63, %v4222_v26  ;;  %v1846_v28 = vsel %vm1845_vm3, %v1844_v22, %v4221_v20  ;;  %v4315_v26 = vld [vmem:[%s4922_s19 + $0xec] ss:$16 sps:$4 sm:$0xff]   ;;  %v4310_v20 = vld [vmem:[%s4922_s19 + $0xe0] ss:$16 sps:$4 sm:$0xff]  }
 0xcfd   : > { %v4225_v21 = vpop.permute.xlu0 %4224 }
 0xcfe   : > { %v4227_v23 = vunpack.i.h.bf16 %v4225_v21  ;;  %v4226_v24 = vunpack.i.l.bf16 %v4225_v21  ;;  %v4313_v21 = vld [vmem:[%s4922_s19 + $0xe8] ss:$16 sps:$4 sm:$0xff]  }
 0xd00   : > { %v2519_v29 = vsel %vm1847_vm4, %v2518_v27, %v4227_v23  ;;  %v1848_v30 = vsel %vm1847_vm4, %v1846_v28, %v4226_v24 }
 0xd01   : > { %v2520_v34 = vpack.c.bf16 %v2519_v29, %v1848_v30 }
 0xd03   : > { %4137 = vmatmul.mubr.bf16.vlgmr.msra.gmra.mrb[12].mxu0 %v2520_v34  ;;  %v3851_v34 = vld [vmem:[%s5598_s23] ss:$0 sm:$0xff] }
 0xd04   : > { %2965 = vmatprep.mubr.bf16.mxu0 %v4601_v32  ;;  %v4268_v32 = vld [vmem:[%s4922_s19] ss:$16 sps:$4 sm:$0xff]   ;;  %2934 = vmatpush1.bf16.msra.mxu0 %v4271_v44 }
 0xd05   : > { %2891 = vmatpush1.bf16.msra.mxu1 %v4268_v32  ;;  %2935 = vmatprep.subr.bf16.mxu0 %v4279_v48  ;;  %v4317_v32 = vld [vmem:[%s4925_s24 + $0xc0] sm:$0xff]   ;;  %v4322_v48 = vld [vmem:[%s4925_s24 + $0x8] sm:$0xff]  }
 0xd06   : > { %2892 = vmatprep.subr.bf16.mxu1 %v4276_v46  ;;  %v4319_v44 = vld [vmem:[%s4925_s24 + $0x80] sm:$0xff]   ;;  %v4321_v46 = vld [vmem:[%s4925_s24 + $0xc8] sm:$0xff]  }
 0xd08   : > { %2936 = vmatpush1.bf16.msra.mxu0 %v4277_v50  ;;  %v4324_v50 = vld [vmem:[%s4925_s24 + $0x50] sm:$0xff]  }
 0xd09   : > { %2893 = vmatpush1.bf16.msra.mxu1 %v4274_v49  ;;  %2937 = vmatprep.subr.bf16.mxu0 %v4285_v62  ;;  %v4323_v49 = vld [vmem:[%s4925_s24 + $0x88] sm:$0xff]   ;;  %v4334_v62 = vld [vmem:[%s4925_s24 + $0x20] sm:$0xff]  }
 0xd0a   : > { %2894 = vmatprep.subr.bf16.mxu1 %v4282_v61  ;;  %v4333_v61 = vld [vmem:[%s4925_s24 + $0xe0] sm:$0xff]  }
 0xd0c   : > { %2938 = vmatpush1.bf16.msra.mxu0 %v4283_v1  ;;  %v4336_v1 = vld [vmem:[%s4925_s24 + $0x68] sm:$0xff]  }
 0xd0d   : > { %2895 = vmatpush1.bf16.msra.mxu1 %v4280_v0  ;;  %2939 = vmatprep.subr.bf16.mxu0 %v4291_v3  ;;  %v4335_v0 = vld [vmem:[%s4925_s24 + $0xa0] sm:$0xff]   ;;  %v4338_v3 = vld [vmem:[%s4925_s24 + $0x28] sm:$0xff]  }
 0xd0e   : > { %2896 = vmatprep.subr.bf16.mxu1 %v4288_v2  ;;  %v4337_v2 = vld [vmem:[%s4925_s24 + $0xe8] sm:$0xff]  }
 0xd10   : > { %2940 = vmatpush1.bf16.msra.mxu0 %v4289_v5  ;;  %v4340_v5 = vld [vmem:[%s4925_s24 + $0x70] sm:$0xff]  }
 0xd11   : > { %2897 = vmatpush1.bf16.msra.mxu1 %v4286_v4  ;;  %2941 = vmatprep.subr.bf16.mxu0 %v4297_v8  ;;  %v4339_v4 = vld [vmem:[%s4925_s24 + $0xa8] sm:$0xff]   ;;  %v4342_v8 = vld [vmem:[%s4925_s24 + $0x30] sm:$0xff]  }
 0xd12   : > { %2898 = vmatprep.subr.bf16.mxu1 %v4294_v7  ;;  %v4341_v7 = vld [vmem:[%s4925_s24 + $0xf0] sm:$0xff]  }
 0xd14   : > { %2942 = vmatpush1.bf16.msra.mxu0 %v4295_v11  ;;  %v4344_v11 = vld [vmem:[%s4925_s24 + $0x78] sm:$0xff]  }
 0xd15   : > { %2899 = vmatpush1.bf16.msra.mxu1 %v4292_v9  ;;  %2943 = vmatprep.subr.bf16.mxu0 %v4303_v14  ;;  %v4343_v9 = vld [vmem:[%s4925_s24 + $0xb0] sm:$0xff]   ;;  %v4346_v14 = vld [vmem:[%s4925_s24 + $0x38] sm:$0xff]  }
 0xd16   : > { %2900 = vmatprep.subr.bf16.mxu1 %v4300_v12  ;;  %v4345_v12 = vld [vmem:[%s4925_s24 + $0xf8] sm:$0xff]  }
 0xd18   : > { %2944 = vmatpush1.bf16.msra.mxu0 %v4301_v16  ;;  %v2708_v16 = vld [vmem:[%s4971_s5] sm:$0xf] }
 0xd19   : > { %2901 = vmatpush1.bf16.msra.mxu1 %v4298_v15  ;;  %2945 = vmatprep.subr.bf16.mxu0 %v4309_v6  ;;  %v4347_v15 = vld [vmem:[%s4925_s24 + $0xb8] sm:$0xff]   ;;  %v2713_v6 = vrot.slane %v2708_v16, %v905_v57 }
 0xd1a   : > { %2902 = vmatprep.subr.bf16.mxu1 %v4306_v17  ;;  %v2724_v17 = vsub.s32 3, %v5041_v56 }
 0xd1c   : > { %2946 = vmatpush1.bf16.msra.mxu0 %v4307_v13  ;;  %v2717_v13 = vrot.slane %v2708_v16, %v909_v58 }
 0xd1d   : > { %2903 = vmatpush1.bf16.msra.mxu1 %v4304_v18  ;;  %2947 = vmatprep.subr.bf16.mxu0 %v4315_v26  ;;  %v2721_v18 = vrot.slane %v2708_v16, %v913_v60 }
 0xd1e   : > { %2904 = vmatprep.subr.bf16.mxu1 %v4312_v19  ;;  %v2725_v19 = vrot.slane %v2708_v16, %v2724_v17 }
 0xd20   : > { %2948 = vmatpush1.bf16.msra.mxu0 %v4313_v21 }
 0xd21   : > { %2905 = vmatpush1.bf16.msra.mxu1 %v4310_v20  ;;  %3998 = vmatprep.subr.bf16.mxu0 %v4317_v32 }
 0xdd6   : > { %v2626_v36 = vpop.f32.mrb[12].mxu0 }
 0xdd7   : > { %v2627_v37 = vadd.f32 %v3842_v35, %v2626_v36  ;;  %v4138_v47 = vpop.f32.mrb[13].mxu0 }
 0xdd8   : > { %v2629_v31 = vpop.f32.mrb[14].mxu0  ;;  %v3852_v47 = vld [vmem:[%s808_s26] ss:$0 sm:$0xff] }
 0xdd9   : > { %v5257_v39 = vadd.f32 %v4420_v38, %v2627_v37  ;;  %v2630_v40 = vadd.f32 %v3842_v35, %v2629_v31  ;;  %v4139_v41 = vpop.f32.mrb[15].mxu0 }
 0xddb   : > { %v5259_v42 = vadd.f32 %v4421_v33, %v2630_v40  ;;  %2637 = vadd.xlane.f32.xlu1 %v5257_v39  ;;  %v4316_v33 = vld [vmem:[%s4925_s24 + $0x40] sm:$0xff]  }
 0xddc   : > { %3976 = vmatprep.subr.bf16.mxu1 %v4316_v33 }
 0xddd   : > { %2639 = vadd.xlane.f32.xlu0 %v5259_v42 }
 0xe68   : > { %v2638_v10 = vpop.xlane.xlu1 %2637 }
 0xe69   : > { %v2641_v51 = vmul.f32 0.0078125, %v2638_v10  ;;  %v4325_v10 = vld [vmem:[%s4925_s24 + $0xd0] sm:$0xff]  }
 0xe6a   : > { %v2640_v25 = vpop.xlane.xlu0 %2639 }
 0xe6b   : > { %v5272_v52 = vsub.f32 %v5257_v39, %v2641_v51  ;;  %v2642_v53 = vmul.f32 0.0078125, %v2640_v25  ;;  %v4326_v51 = vld [vmem:[%s4925_s24 + $0x10] sm:$0xff]  }
 0xe6c   : > { %v4327_v25 = vld [vmem:[%s4925_s24 + $0x90] sm:$0xff]  }
 0xe6d   : > { %v5275_v54 = vsub.f32 %v5259_v42, %v2642_v53  ;;  %v2645_v55 = vmul.f32 %v5272_v52, %v5272_v52  ;;  %v4329_v53 = vld [vmem:[%s4925_s24 + $0xd8] sm:$0xff]  }
 0xe6f   : > { %2647 = vadd.xlane.f32.xlu0 %v2645_v55  ;;  %v2646_v59 = vmul.f32 %v5275_v54, %v5275_v54  ;;  %v4331_v55 = vld [vmem:[%s4925_s24 + $0x98] sm:$0xff]  }
 0xe73   : > { %2649 = vadd.xlane.f32.xlu0 %v2646_v59  ;;  %v4332_v59 = vld [vmem:[%s4925_s24 + $0x60] sm:$0xff]  }
 0xefc   : > { %v2648_v63 = vpop.xlane.xlu0 %2647 }
 0xefd   : > { %v2651_v22 = vmul.f32 0.0078125, %v2648_v63 }
 0xeff   : > { %v2653_v23 = vadd.f32 1e-05, %v2651_v22 }
 0xf00   : > { %v2650_v24 = vpop.xlane.xlu0 %2649 }
 0xf01   : > { %4384 = vrsqrt.f32 %v2653_v23  ;;  %v2652_v27 = vmul.f32 0.0078125, %v2650_v24 }
 0xf03   : > { %v2654_v28 = vadd.f32 1e-05, %v2652_v27 }
 0xf05   : > { %4386 = vrsqrt.f32 %v2654_v28 }
 0xf0b   : > { %v4385_v29 = vpop.eup %4384 }
 0xf0c   : > { %v2657_v30 = vmul.f32 %v4385_v29, %v5272_v52  ;;  %v4328_v52 = vld [vmem:[%s4925_s24 + $0x58] sm:$0xff]  }
 0xf0e   : > { %v2665_v37 = vmul.f32 %v3851_v34, %v2657_v30 }
 0xf0f   : > { %v4387_v35 = vpop.eup %4386 }
 0xf10   : > { %v2658_v36 = vmul.f32 %v4387_v35, %v5275_v54  ;;  %v2673_v38 = vadd.f32 %v3852_v47, %v2665_v37  ;;  %v4330_v54 = vld [vmem:[%s4925_s24 + $0x18] sm:$0xff]  }
 0xf12   : > { %v2666_v31 = vmul.f32 %v3851_v34, %v2658_v36 }
 0xf14   : > { %v2674_v40 = vadd.f32 %v3852_v47, %v2666_v31 }
 0xf16   : > { %v2675_v41 = vpack.c.bf16 %v2674_v40, %v2673_v38 }
 0xf18   : > { %2923 = vmatmul.mubr.bf16.vlgmr.msra.gmra.mrb[28].mxu1 %v2675_v41  ;;  %2966 = vmatmul.mubr.bf16.vlgmr.msra.gmra.mrb[16].mxu0 %v2675_v41 }
 0xf19   : > { %3977 = vmatpush3.bf16.msra.mxu1 %v4318_v43  ;;  %3999 = vmatpush3.bf16.msra.mxu0 %v4319_v44 }
 0xf1a   : > { %3978 = vmatprep.subr.bf16.mxu1 %v4320_v45  ;;  %4000 = vmatprep.subr.bf16.mxu0 %v4321_v46 }
 0xf1d   : > { %3979 = vmatpush3.bf16.msra.mxu1 %v4322_v48  ;;  %4001 = vmatpush3.bf16.msra.mxu0 %v4323_v49 }
 0xf1e   : > { %3980 = vmatprep.subr.bf16.mxu1 %v4324_v50  ;;  %4002 = vmatprep.subr.bf16.mxu0 %v4325_v10 }
 0xf21   : > { %3981 = vmatpush3.bf16.msra.mxu1 %v4326_v51  ;;  %4003 = vmatpush3.bf16.msra.mxu0 %v4327_v25 }
 0xf22   : > { %3982 = vmatprep.subr.bf16.mxu1 %v4328_v52  ;;  %4004 = vmatprep.subr.bf16.mxu0 %v4329_v53 }
 0xf25   : > { %3983 = vmatpush3.bf16.msra.mxu1 %v4330_v54  ;;  %4005 = vmatpush3.bf16.msra.mxu0 %v4331_v55 }
 0xf26   : > { %3984 = vmatprep.subr.bf16.mxu1 %v4332_v59  ;;  %4006 = vmatprep.subr.bf16.mxu0 %v4333_v61 }
 0xf29   : > { %3985 = vmatpush3.bf16.msra.mxu1 %v4334_v62  ;;  %4007 = vmatpush3.bf16.msra.mxu0 %v4335_v0 }
 0xf2a   : > { %3986 = vmatprep.subr.bf16.mxu1 %v4336_v1  ;;  %4008 = vmatprep.subr.bf16.mxu0 %v4337_v2 }
 0xf2d   : > { %3987 = vmatpush3.bf16.msra.mxu1 %v4338_v3  ;;  %4009 = vmatpush3.bf16.msra.mxu0 %v4339_v4 }
 0xf2e   : > { %3988 = vmatprep.subr.bf16.mxu1 %v4340_v5  ;;  %4010 = vmatprep.subr.bf16.mxu0 %v4341_v7 }
 0xf31   : > { %3989 = vmatpush3.bf16.msra.mxu1 %v4342_v8  ;;  %4011 = vmatpush3.bf16.msra.mxu0 %v4343_v9 }
 0xf32   : > { %3990 = vmatprep.subr.bf16.mxu1 %v4344_v11  ;;  %4012 = vmatprep.subr.bf16.mxu0 %v4345_v12 }
 0xf35   : > { %3991 = vmatpush3.bf16.msra.mxu1 %v4346_v14  ;;  %4013 = vmatpush3.bf16.msra.mxu0 %v4347_v15 }
 0xfeb   : > { %v2924_v26 = vpop.f32.mrb[28].mxu1  ;;  %v2967_v20 = vpop.f32.mrb[16].mxu0 }
 0xfec   : > { %v2925_v21 = vadd.f32 %v2924_v26, %v2713_v6  ;;  %v2968_v63 = vadd.f32 %v2967_v20, %v2721_v18  ;;  %v2926_v22 = vpop.f32.mrb[29].mxu1  ;;  %v2969_v23 = vpop.f32.mrb[17].mxu0 }
 0xfed   : > { %v5357_v24 = vadd.f32 %v2926_v22, %v2717_v13  ;;  %v5359_v27 = vadd.f32 %v2969_v23, %v2725_v19  ;;  %v2928_v28 = vpop.f32.mrb[30].mxu1  ;;  %v2971_v29 = vpop.f32.mrb[18].mxu0 }
 0xfee   : > { %v5361_v57 = vmul.f32 0.70710677, %v2925_v21  ;;  %v5363_v30 = vmul.f32 0.70710677, %v2968_v63  ;;  %v2930_v36 = vpop.f32.mrb[31].mxu1  ;;  %v2973_v38 = vpop.f32.mrb[19].mxu0  ;;  %v5375_v43 = vadd.f32 %v2928_v28, %v2713_v6  ;;  %v5380_v46 = vadd.f32 %v2971_v29, %v2721_v18 }
 0xfef   : > { %v5366_v56 = vmul.f32 0.70710677, %v5357_v24  ;;  %v5372_v35 = vmul.f32 0.70710677, %v5359_v27  ;;  %v5382_v49 = vadd.f32 %v2930_v36, %v2717_v13  ;;  %v5392_v61 = vadd.f32 %v2973_v38, %v2725_v19 }
 0xff0   : > { %v3008_v58 = vand.u32 2147483647, %v5361_v57  ;;  %v3010_v60 = vand.u32 2147483647, %v5363_v30  ;;  %v5378_v45 = vmul.f32 0.70710677, %v5375_v43 }
 0xff1   : > { %v3009_v34 = vand.u32 2147483647, %v5366_v56  ;;  %v3011_v33 = vand.u32 2147483647, %v5372_v35  ;;  %v5386_v51 = vmul.f32 0.70710677, %v5380_v46 }
 0xff2   : > { %v3016_v37 = vmul.f32 0.3275911, %v3008_v58  ;;  %v3018_v47 = vmul.f32 0.3275911, %v3010_v60  ;;  %v3012_v50 = vand.u32 2147483647, %v5378_v45 }
 0xff3   : > { %v3017_v31 = vmul.f32 0.3275911, %v3009_v34  ;;  %v3019_v44 = vmul.f32 0.3275911, %v3011_v33  ;;  %v3120_v10 = vsub.f32 0.0, %v3008_v58  ;;  %v3122_v25 = vsub.f32 0.0, %v3010_v60 }
 0xff4   : > { %v3024_v40 = vadd.f32 1.0, %v3016_v37  ;;  %v3026_v41 = vadd.f32 1.0, %v3018_v47  ;;  %v3020_v52 = vmul.f32 0.3275911, %v3012_v50  ;;  %v3121_v53 = vsub.f32 0.0, %v3009_v34 }
 0xff5   : > { %v3025_v32 = vadd.f32 1.0, %v3017_v31  ;;  %v3027_v48 = vadd.f32 1.0, %v3019_v44  ;;  %v3014_v54 = vand.u32 2147483647, %v5386_v51  ;;  %v5390_v55 = vmul.f32 0.70710677, %v5382_v49 }
 0xff6   : > { %4388 = vrcp.f32 %v3024_v40  ;;  %v3028_v59 = vadd.f32 1.0, %v3020_v52  ;;  %v3128_v62 = vmul.f32 %v3120_v10, %v3008_v58  ;;  %v3130_v3 = vmul.f32 %v3122_v25, %v3010_v60 }
 0xff7   : > { %4390 = vrcp.f32 %v3026_v41  ;;  %v3022_v0 = vmul.f32 0.3275911, %v3014_v54  ;;  %v5395_v1 = vand.u32 2147483647, %v5390_v55  ;;  %v3123_v4 = vsub.f32 0.0, %v3011_v33 }
 0xff8   : > { %4392 = vrcp.f32 %v3025_v32  ;;  %v3129_v8 = vmul.f32 %v3121_v53, %v3009_v34  ;;  %v5403_v12 = vmul.f32 0.5, %v2925_v21  ;;  %v5405_v14 = vmul.f32 0.5, %v2968_v63 }
 0xff9   : > { %4394 = vrcp.f32 %v3027_v48  ;;  %v3030_v9 = vadd.f32 1.0, %v3022_v0  ;;  %v3021_v11 = vmul.f32 0.3275911, %v5395_v1  ;;  %v5409_v16 = vmul.f32 0.70710677, %v5392_v61 }
 0xffa   : > { %4396 = vrcp.f32 %v3028_v59  ;;  %v3136_v6 = vmul.f32 1.442695, %v3128_v62  ;;  %v3140_v26 = vmul.f32 1.442695, %v3130_v3  ;;  %v3131_v20 = vmul.f32 %v3123_v4, %v3011_v33 }
 0xffb   : > { %4398 = vrcp.f32 %v3030_v9  ;;  %v3029_v18 = vadd.f32 1.0, %v3021_v11  ;;  %v5414_v22 = vand.u32 2147483647, %v5409_v16  ;;  %v3138_v23 = vmul.f32 1.442695, %v3129_v8 }
 0xffc   : > { %v3124_v28 = vsub.f32 0.0, %v3012_v50  ;;  %v3126_v60 = vsub.f32 0.0, %v3014_v54  ;;  %v3142_v38 = vmul.f32 1.442695, %v3131_v20  ;;  %vm2992_vm5 = vcmp.ge.f32.partialorder %v5361_v57, 0.0 }
 0xffd   : > { %4400 = vrcp.f32 %v3029_v18  ;;  %v3023_v34 = vmul.f32 0.3275911, %v5414_v22  ;;  %v3125_v3 = vsub.f32 0.0, %v5395_v1  ;;  %vm2994_vm6 = vcmp.ge.f32.partialorder %v5363_v30, 0.0 }
 0xffe   : > { %4402 = vpow2.f32 %v3136_v6  ;;  %v3132_v10 = vmul.f32 %v3124_v28, %v3012_v50  ;;  %v3134_v25 = vmul.f32 %v3126_v60, %v3014_v54  ;;  %v3127_v28 = vsub.f32 0.0, %v5414_v22 }
 0xfff   : > { %4404 = vpow2.f32 %v3140_v26  ;;  %v3031_v40 = vadd.f32 1.0, %v3023_v34  ;;  %vm2993_vm7 = vcmp.ge.f32.partialorder %v5366_v56, 0.0  ;;  %vm2996_vm8 = vcmp.ge.f32.partialorder %v5378_v45, 0.0 }
0x1000   : > { %v5397_v2 = vpop.eup %4388  ;;  %4406 = vpow2.f32 %v3138_v23  ;;  %v3144_v11 = vmul.f32 1.442695, %v3132_v10  ;;  %v3133_v23 = vmul.f32 %v3125_v3, %v5395_v1  ;;  %vm2998_vm9 = vcmp.ge.f32.partialorder %v5386_v51, 0.0 }
0x1001   : > { %v5399_v5 = vpop.eup %4390  ;;  %v3048_v7 = vmul.f32 1.0614054, %v5397_v2  ;;  %4408 = vrcp.f32 %v3031_v40  ;;  %vm2995_vm10 = vcmp.ge.f32.partialorder %v5372_v35, 0.0  ;;  %vm2997_vm11 = vcmp.ge.f32.partialorder %v5390_v55, 0.0 }
0x1002   : > { %v3050_v15 = vmul.f32 1.0614054, %v5399_v5  ;;  %v5411_v13 = vpop.eup %4392  ;;  %4410 = vpow2.f32 %v3142_v38  ;;  %vm2999_vm12 = vcmp.ge.f32.partialorder %v5409_v16, 0.0  ;;  %v2979_v16 = vmul.f32 0.5, %v5359_v27 }
0x1003   : > { %v3056_v17 = vadd.f32 -1.4531521, %v3048_v7  ;;  %v3049_v63 = vmul.f32 1.0614054, %v5411_v13  ;;  %v5418_v29 = vpop.eup %4394  ;;  %4412 = vpow2.f32 %v3144_v11 }
0x1004   : > { %v3058_v19 = vadd.f32 -1.4531521, %v3050_v15  ;;  %v3051_v47 = vmul.f32 1.0614054, %v5418_v29  ;;  %v5425_v44 = vpop.eup %4396 }
0x1005   : > { %v3064_v21 = vmul.f32 %v5397_v2, %v3056_v17  ;;  %v3057_v37 = vadd.f32 -1.4531521, %v3049_v63  ;;  %v3052_v62 = vmul.f32 1.0614054, %v5425_v44  ;;  %v5432_v4 = vpop.eup %4398  ;;  %v3148_v17 = vmul.f32 1.442695, %v3134_v25 }
0x1006   : > { %v3066_v58 = vmul.f32 %v5399_v5, %v3058_v19  ;;  %v3059_v32 = vadd.f32 -1.4531521, %v3051_v47  ;;  %v3054_v15 = vmul.f32 1.0614054, %v5432_v4 }
0x1007   : > { %v3072_v36 = vadd.f32 1.4214138, %v3064_v21  ;;  %v3065_v33 = vmul.f32 %v5411_v13, %v3057_v37  ;;  %v3060_v8 = vadd.f32 -1.4531521, %v3052_v62  ;;  %v5440_v20 = vpop.eup %4400  ;;  %4414 = vpow2.f32 %v3148_v17 }
0x1008   : > { %v3074_v31 = vadd.f32 1.4214138, %v3066_v58  ;;  %v3067_v59 = vmul.f32 %v5418_v29, %v3059_v32  ;;  %v3062_v63 = vadd.f32 -1.4531521, %v3054_v15  ;;  %v4403_v58 = vpop.eup %4402  ;;  %v3053_v38 = vmul.f32 1.0614054, %v5440_v20 }
0x1009   : > { %v3080_v41 = vmul.f32 %v5397_v2, %v3072_v36  ;;  %v3073_v53 = vadd.f32 1.4214138, %v3065_v33  ;;  %v3068_v26 = vmul.f32 %v5425_v44, %v3060_v8  ;;  %v4405_v47 = vpop.eup %4404  ;;  %v3146_v62 = vmul.f32 1.442695, %v3133_v23 }
0x100a   : > { %v3082_v48 = vmul.f32 %v5399_v5, %v3074_v31  ;;  %v3075_v54 = vadd.f32 1.4214138, %v3067_v59  ;;  %v3070_v31 = vmul.f32 %v5432_v4, %v3062_v63  ;;  %v4407_v40 = vpop.eup %4406 }
0x100b   : > { %v3088_v52 = vadd.f32 -0.28449672, %v3080_v41  ;;  %v3081_v50 = vmul.f32 %v5411_v13, %v3073_v53  ;;  %v3076_v37 = vadd.f32 1.4214138, %v3068_v26  ;;  %v5452_v32 = vpop.eup %4408  ;;  %4416 = vpow2.f32 %v3146_v62 }
0x100c   : > { %v3090_v0 = vadd.f32 -0.28449672, %v3082_v48  ;;  %v3083_v19 = vmul.f32 %v5418_v29, %v3075_v54  ;;  %v4608_v48 = vmov -1.0   ;;  %v3078_v25 = vadd.f32 1.4214138, %v3070_v31 }
0x100d   : > { %v3096_v7 = vmul.f32 %v5397_v2, %v3088_v52  ;;  %v3089_v18 = vadd.f32 -0.28449672, %v3081_v50  ;;  %v3000_v10 = vsel %vm2992_vm5, 1.0, %v4608_v48  ;;  %v3061_v52 = vadd.f32 -1.4531521, %v3053_v38 }
0x100e   : > { %v3098_v9 = vmul.f32 %v5399_v5, %v3090_v0  ;;  %v3091_v36 = vadd.f32 -0.28449672, %v3083_v19  ;;  %v4411_v0 = vpop.eup %4410  ;;  %v3002_v3 = vsel %vm2994_vm6, 1.0, %v4608_v48  ;;  %v3055_v57 = vmul.f32 1.0614054, %v5452_v32 }
0x100f   : > { %v3104_v6 = vadd.f32 0.2548296, %v3096_v7  ;;  %v3097_v34 = vmul.f32 %v5411_v13, %v3089_v18  ;;  %v3086_v7 = vmul.f32 %v5432_v4, %v3078_v25  ;;  %v3069_v50 = vmul.f32 %v5440_v20, %v3061_v52 }
0x1010   : > { %v3106_v21 = vadd.f32 0.2548296, %v3098_v9  ;;  %v3099_v33 = vmul.f32 %v5418_v29, %v3091_v36  ;;  %v3001_v56 = vsel %vm2993_vm7, 1.0, %v4608_v48  ;;  %v3004_v38 = vsel %vm2996_vm8, 1.0, %v4608_v48 }
0x1011   : > { %v3112_v60 = vmul.f32 %v5397_v2, %v3104_v6  ;;  %v3105_v41 = vadd.f32 0.2548296, %v3097_v34  ;;  %v3084_v2 = vmul.f32 %v5425_v44, %v3076_v37  ;;  %v3094_v15 = vadd.f32 -0.28449672, %v3086_v7 }
0x1012   : > { %v3114_v1 = vmul.f32 %v5399_v5, %v3106_v21  ;;  %v3135_v5 = vmul.f32 %v3127_v28, %v5414_v22  ;;  %v3107_v9 = vadd.f32 0.2548296, %v3099_v33  ;;  %v3077_v17 = vadd.f32 1.4214138, %v3069_v50  ;;  %v4413_v28 = vpop.eup %4412 }
0x1013   : > { %v3152_v53 = vmul.f32 %v4403_v58, %v3112_v60  ;;  %v3092_v59 = vadd.f32 -0.28449672, %v3084_v2  ;;  %v3113_v8 = vmul.f32 %v5411_v13, %v3105_v41  ;;  %v3063_v22 = vadd.f32 -1.4531521, %v3055_v57  ;;  %v4415_v31 = vpop.eup %4414 }
0x1014   : > { %v3154_v54 = vmul.f32 %v4405_v47, %v3114_v1  ;;  %v3150_v30 = vmul.f32 1.442695, %v3135_v5  ;;  %v3102_v19 = vmul.f32 %v5432_v4, %v3094_v15  ;;  %v3085_v26 = vmul.f32 %v5440_v20, %v3077_v17 }
0x1015   : > { %v3100_v11 = vmul.f32 %v5425_v44, %v3092_v59  ;;  %v3160_v6 = vsub.f32 1.0, %v3152_v53  ;;  %v3071_v21 = vmul.f32 %v5452_v32, %v3063_v22  ;;  %v3153_v13 = vmul.f32 %v4407_v40, %v3113_v8  ;;  %v4417_v7 = vpop.eup %4416 }
0x1016   : > { %v3162_v63 = vsub.f32 1.0, %v3154_v54  ;;  %v3115_v58 = vmul.f32 %v5418_v29, %v3107_v9  ;;  %v3110_v60 = vadd.f32 0.2548296, %v3102_v19  ;;  %v3093_v34 = vadd.f32 -0.28449672, %v3085_v26 }
0x1017   : > { %v3108_v18 = vadd.f32 0.2548296, %v3100_v11  ;;  %v3079_v36 = vadd.f32 1.4214138, %v3071_v21  ;;  %v3168_v37 = vmul.f32 %v3160_v6, %v3000_v10  ;;  %4418 = vpow2.f32 %v3150_v30 }
0x1018   : > { %v3118_v40 = vmul.f32 %v5432_v4, %v3110_v60  ;;  %v3101_v45 = vmul.f32 %v5440_v20, %v3093_v34  ;;  %v3170_v1 = vmul.f32 %v3162_v63, %v3002_v3  ;;  %v3161_v41 = vsub.f32 1.0, %v3153_v13 }
0x1019   : > { %v3116_v23 = vmul.f32 %v5425_v44, %v3108_v18  ;;  %v3087_v44 = vmul.f32 %v5452_v32, %v3079_v36  ;;  %v3155_v33 = vmul.f32 %v4411_v0, %v3115_v58  ;;  %v3176_v52 = vadd.f32 1.0, %v3168_v37 }
0x101a   : > { %v3158_v2 = vmul.f32 %v4415_v31, %v3118_v40  ;;  %v3109_v10 = vadd.f32 0.2548296, %v3101_v45  ;;  %v2980_v53 = vmul.f32 0.5, %v5375_v43  ;;  %v3006_v4 = vsel %vm2998_vm9, 1.0, %v4608_v48 }
0x101b   : > { %v3156_v47 = vmul.f32 %v4413_v28, %v3116_v23  ;;  %v3095_v25 = vadd.f32 -0.28449672, %v3087_v44  ;;  %v3178_v50 = vadd.f32 1.0, %v3170_v1  ;;  %v3169_v51 = vmul.f32 %v3161_v41, %v3001_v56 }
0x101c   : > { %v3166_v62 = vsub.f32 1.0, %v3158_v2  ;;  %v3117_v5 = vmul.f32 %v5440_v20, %v3109_v10  ;;  %v3163_v57 = vsub.f32 1.0, %v3155_v33  ;;  %v3184_v43 = vmul.f32 %v3176_v52, %v5403_v12 }
0x101d   : > { %v3164_v29 = vsub.f32 1.0, %v3156_v47  ;;  %v3103_v3 = vmul.f32 %v5452_v32, %v3095_v25  ;;  %v3003_v11 = vsel %vm2995_vm10, 1.0, %v4608_v48  ;;  %v2982_v20 = vmul.f32 0.5, %v5380_v46 }
0x101e   : > { %v3174_v54 = vmul.f32 %v3166_v62, %v3006_v4  ;;  %v3157_v8 = vmul.f32 %v4417_v7, %v3117_v5  ;;  %v3005_v22 = vsel %vm2997_vm11, 1.0, %v4608_v48  ;;  %v3186_v30 = vmul.f32 %v3178_v50, %v5405_v14 }
0x101f   : > { %v3172_v59 = vmul.f32 %v3164_v29, %v3004_v38  ;;  %v3111_v9 = vadd.f32 0.2548296, %v3103_v3  ;;  %v3177_v19 = vadd.f32 1.0, %v3169_v51  ;;  %v3171_v12 = vmul.f32 %v3163_v57, %v3003_v11 }
0x1020   : > { %v3182_v17 = vadd.f32 1.0, %v3174_v54  ;;  %v3165_v6 = vsub.f32 1.0, %v3157_v8  ;;  %v2977_v13 = vmul.f32 0.5, %v5357_v24  ;;  %v2981_v23 = vmul.f32 0.5, %v5382_v49 }
0x1021   : > { %v3180_v0 = vadd.f32 1.0, %v3172_v59  ;;  %v3119_v18 = vmul.f32 %v5452_v32, %v3111_v9  ;;  %v4419_v55 = vpop.eup %4418  ;;  %v3007_v32 = vsel %vm2999_vm12, 1.0, %v4608_v48  ;;  %v3179_v14 = vadd.f32 1.0, %v3171_v12  ;;  %v3885_v48 = vld [vmem:[%s815_s25] ss:$0 sm:$0xff]  ;;  %s5599_s25 = sld [smem:[#allocation27_spill]] (!%p3918_p5) }
0x1022   : > { %v3190_v21 = vmul.f32 %v3182_v17, %v2982_v20  ;;  %v3173_v35 = vmul.f32 %v3165_v6, %v3005_v22  ;;  %v3185_v60 = vmul.f32 %v3177_v19, %v2977_v13  ;;  %v2983_v37 = vmul.f32 0.5, %v5392_v61  ;;  %v3920_v22 = vld [vmem:[%s5600_s30] ss:$0 sm:$0xff] (!%p3918_p5) }
0x1023   : > { %v3188_v15 = vmul.f32 %v3180_v0, %v2980_v53  ;;  %v3159_v63 = vmul.f32 %v4419_v55, %v3119_v18  ;;  %v3187_v31 = vmul.f32 %v3179_v14, %v2979_v16 }
0x1024   : > { %v3194_v46 = vpack.c.bf16 %v3190_v21, %v3186_v30  ;;  %v3181_v28 = vadd.f32 1.0, %v3173_v35 }
0x1025   : > { %v3192_v26 = vpack.c.bf16 %v3188_v15, %v3184_v43  ;;  %v3167_v58 = vsub.f32 1.0, %v3159_v63 }
0x1026   : > { %v3189_v34 = vmul.f32 %v3181_v28, %v2981_v23 }
0x1027   : > { %v3175_v36 = vmul.f32 %v3167_v58, %v3007_v32  ;;  %v3919_v20 = vld [vmem:[%s5599_s25] ss:$0 sm:$0xff] (!%p3918_p5) }
0x1028   : > { %v3193_v47 = vpack.c.bf16 %v3189_v34, %v3185_v60 }
0x1029   : > { %v3183_v56 = vadd.f32 1.0, %v3175_v36 }
0x102a   : > { %3491 = vmatprep.mubr.bf16.mxu1 %v3193_v47 }
0x102b   : > { %v3191_v24 = vmul.f32 %v3183_v56, %v2983_v37  ;;  %3492 = vmatmul.mubr.bf16.vlgmr.msra.gmra.mrb[32].mxu1 %v3192_v26 }
0x102d   : > { %v3195_v49 = vpack.c.bf16 %v3191_v24, %v3187_v31 }
0x102f   : > { %3532 = vmatprep.mubr.bf16.mxu0 %v3195_v49 }
0x1030   : > { %3533 = vmatmul.mubr.bf16.vlgmr.msra.gmra.mrb[20].mxu0 %v3194_v46 }
0x10fe   : > { %v3992_v38 = vpop.f32.mrb[32].mxu1 }
0x10ff   : > { %v3993_v40 = vpop.f32.mrb[33].mxu1 }
0x1100   : > { %v3994_v45 = vadd.f32 %v3993_v40, %v3992_v38  ;;  %v3995_v27 = vpop.f32.mrb[34].mxu1 }
0x1101   : > { %v3996_v44 = vpop.f32.mrb[35].mxu1 }
0x1102   : > { %v3494_v1 = vadd.f32 %v3994_v45, %v3885_v48  ;;  %v3997_v41 = vadd.f32 %v3996_v44, %v3995_v27 }
0x1103   : > { %v4014_v61 = vpop.f32.mrb[20].mxu0 }
0x1104   : > { %v4015_v29 = vpop.f32.mrb[21].mxu0  ;;  %v3497_v10 = vadd.f32 %v3997_v41, %v3885_v48 }
0x1105   : > { %v4016_v33 = vadd.f32 %v4015_v29, %v4014_v61  ;;  %v4017_v2 = vpop.f32.mrb[22].mxu0 }
0x1106   : > { %v4018_v25 = vpop.f32.mrb[23].mxu0 }
0x1107   : > { %v3535_v52 = vadd.f32 %v4016_v33, %v3494_v1  ;;  %v4019_v53 = vadd.f32 %v4018_v25, %v4017_v2  ;;  %3548 = sbr.rel (%p3918_p5) target bundleno = 4679 (0x1247), region = 116 }
0x1109   : > { %v3541_v59 = vadd.f32 %v3535_v52, %v5257_v39  ;;  %v3538_v4 = vadd.f32 %v4019_v53, %v3497_v10 }
0x110b   : > { %3543 = vst [vmem:[#allocation2] sm:$0xff] %v3541_v59  ;;  %v3542_v62 = vadd.f32 %v3538_v4, %v5259_v42  ;;  %3551 = vadd.xlane.f32.xlu0 (!%p3918_p5), %v3541_v59 }
0x110d   : > { %3544 = vst [vmem:[#allocation2 + $0x8] sm:$0xff] %v3542_v62 }
0x110f   : > { %3553 = vadd.xlane.f32.xlu0 %v3542_v62 }
0x1198   : > { %v3552_v5 = vpop.xlane.xlu0 %3551 }
0x1199   : > { %v3555_v3 = vmul.f32 0.0078125, %v3552_v5 }
0x119b   : > { %v3557_v7 = vsub.f32 %v3541_v59, %v3555_v3 }
0x119c   : > { %v3554_v50 = vpop.xlane.xlu0 %3553 }
0x119d   : > { %v3556_v51 = vmul.f32 0.0078125, %v3554_v50  ;;  %v3559_v0 = vmul.f32 %v3557_v7, %v3557_v7 }
0x119f   : > { %v3558_v57 = vsub.f32 %v3542_v62, %v3556_v51  ;;  %3561 = vadd.xlane.f32.xlu1 %v3559_v0 }
0x11a1   : > { %v3560_v54 = vmul.f32 %v3558_v57, %v3558_v57 }
0x11a3   : > { %3563 = vadd.xlane.f32.xlu1 %v3560_v54 }
0x122c   : > { %v3562_v39 = vpop.xlane.xlu1 %3561 }
0x122d   : > { %v3565_v8 = vmul.f32 0.0078125, %v3562_v39 }
0x122f   : > { %v3567_v9 = vadd.f32 1e-05, %v3565_v8 }
0x1230   : > { %v3564_v42 = vpop.xlane.xlu1 %3563 }
0x1231   : > { %4422 = vrsqrt.f32 %v3567_v9  ;;  %v3566_v43 = vmul.f32 0.0078125, %v3564_v42 }
0x1233   : > { %v3568_v11 = vadd.f32 1e-05, %v3566_v43 }
0x1235   : > { %4424 = vrsqrt.f32 %v3568_v11 }
0x123b   : > { %v4423_v15 = vpop.eup %4422 }
0x123c   : > { %v3571_v17 = vmul.f32 %v4423_v15, %v3557_v7 }
0x123e   : > { %v3579_v6 = vmul.f32 %v3919_v20, %v3571_v17 }
0x123f   : > { %v4425_v18 = vpop.eup %4424 }
0x1240   : > { %v3587_v55 = vadd.f32 %v3920_v22, %v3579_v6  ;;  %v3572_v30 = vmul.f32 %v4425_v18, %v3558_v57 }
0x1242   : > { %3589 = vst [vmem:[%s5601_s16] sm:$0xff] %v3587_v55  ;;  %v3580_v19 = vmul.f32 %v3919_v20, %v3572_v30 }
0x1244   : > { %v3588_v26 = vadd.f32 %v3920_v22, %v3580_v19 }
0x1246   : > { %3590 = vst [vmem:[%s5601_s16 + $0x8] sm:$0xff] %v3588_v26 }
0x1247 PF: > { %s5602_s30 = sld [smem:[#allocation14_spill]]  ;;  %s5603_s13 = sld [smem:[#allocation13_spill]] }
0x1248   : > { %s5604_s29 = sld [smem:[#allocation15_spill]]  ;;  %s5605_s27 = smov %s4580_s28 }
0x124d   : > { %p34_p6 = scmp.ge.s32.totalorder %s5602_s30, 5   ;;  %s5606_s28 = smov %s5603_s13 }
0x124f   :  { %36 = sbr.rel (!%p34_p6) target bundleno = 22 (0x16), region = 197 }
0x1256   :  { %3602 = vsyncpa [#allocation4], 1 }
0x1257   :  { %3604 = vsyncpa [#allocation4 + $0x1], 1 }
0x1258   :  { %3605 = vsyncpa [#allocation6], 1 }
0x1259   :  { %3607 = vsyncpa [#allocation6 + $0x1], 1 }
0x125a   :  { %3608 = vsyncpa [#allocation9], 1 }
0x125b   :  { %3610 = vsyncpa [#allocation9 + $0x1], 1 }

</bundles_post_ra>
